<compile_context>
chip_gen: v5e
topology: v5e:2x2
jax: 0.10.0
libtpu: 0.0.40
codegen_flags: <defaults>
</compile_context>

<pallas_src>
import functools

import jax
import jax.numpy as jnp
from jax.experimental import pallas as pl
from jax.experimental.pallas import tpu as pltpu


# ---------------------------------------------------------------------------
# In-kernel helpers
# ---------------------------------------------------------------------------
def _tap_masks(h, w, hw):
    """Validity masks (1, hw) (or None) for the 9 taps of a 3x3 SAME conv.

    Output position p = y*w + x; tap (dy, dx) reads input (y+dy-1, x+dx-1),
    which is a zero-padding position iff the row/col condition fails.  The
    same masks also kill every lane that pltpu.roll wraps around.
    """
    pos = jax.lax.broadcasted_iota(jnp.int32, (1, hw), 1)
    col = (pos & (w - 1)) if (w & (w - 1)) == 0 else (pos % w)
    row_ok = (pos >= w, None, pos < (h - 1) * w)      # dy = 0, 1, 2
    col_ok = (col >= 1, None, col <= w - 2)           # dx = 0, 1, 2
    masks = []
    for dy in range(3):
        for dx in range(3):
            m = row_ok[dy]
            if col_ok[dx] is not None:
                m = col_ok[dx] if m is None else jnp.logical_and(m, col_ok[dx])
            masks.append(m)
    return masks


# ---------------------------------------------------------------------------
# Fused kernel: conv1 + BN1(train) + ReLU + conv2 + BN2(train) + ReLU
# ---------------------------------------------------------------------------
def _vgg_block_kernel(x_ref, w1_ref, w2_ref, g1_ref, bt1_ref, g2_ref, bt2_ref,
                      o_ref, *, n, h, w, eps):
    hw = h * w
    inv_count = 1.0 / float(n * hw)
    cmid = w1_ref.shape[1]
    cout = w2_ref.shape[1]

    # Built once per kernel invocation; reused by every conv below.
    masks = _tap_masks(h, w, hw)

    def conv3x3(a, wk):
        """3x3 SAME conv of one image: a (Cin, hw) f32, wk (9, Cout, Cin) f32."""
        acc = None
        for k in range(9):
            dy, dx = divmod(k, 3)
            s = (dy - 1) * w + (dx - 1)               # flat lane shift of the tap
            tap = a if s == 0 else pltpu.roll(a, shift=(-s) % hw, axis=1)
            if masks[k] is not None:
                tap = jnp.where(masks[k], tap, 0.0)
            part = jnp.dot(wk[k], tap, preferred_element_type=jnp.float32)
            acc = part if acc is None else acc + part
        return acc                                    # (Cout, hw) f32

    def bn_scale_shift(s, ss, gamma, beta):
        """(C,1) scale/shift from batch [sum, sum_sq] (train-mode, biased var)."""
        mean = s * inv_count
        var = ss * inv_count - mean * mean            # TODO(synk): two-pass at real sizes
        scale = gamma * jax.lax.rsqrt(var + eps)
        return scale, beta - mean * scale

    w1 = w1_ref[...]
    w2 = w2_ref[...]

    # ---- conv1 over all images + fused batch statistics -------------------
    y1 = []
    s1 = jnp.zeros((cmid, 1), jnp.float32)
    ss1 = jnp.zeros((cmid, 1), jnp.float32)
    for i in range(n):
        y = conv3x3(x_ref[i], w1)
        y1.append(y)
        s1 = s1 + jnp.sum(y, axis=1, keepdims=True)
        ss1 = ss1 + jnp.sum(y * y, axis=1, keepdims=True)
    sc1, sh1 = bn_scale_shift(s1, ss1, g1_ref[...], bt1_ref[...])

    # ---- BN1 + ReLU + conv2 over all images + fused batch statistics ------
    y2 = []
    s2 = jnp.zeros((cout, 1), jnp.float32)
    ss2 = jnp.zeros((cout, 1), jnp.float32)
    for i in range(n):
        a = jnp.maximum(y1[i] * sc1 + sh1, 0.0)
        y = conv3x3(a, w2)
        y2.append(y)
        s2 = s2 + jnp.sum(y, axis=1, keepdims=True)
        ss2 = ss2 + jnp.sum(y * y, axis=1, keepdims=True)
    sc2, sh2 = bn_scale_shift(s2, ss2, g2_ref[...], bt2_ref[...])

    # ---- BN2 + ReLU -> output (lane-dense (Cout, hw) stores per image) ----
    for i in range(n):
        o_ref[i] = jnp.maximum(y2[i] * sc2 + sh2, 0.0)


# ---------------------------------------------------------------------------
# VGGBlock forward
# ---------------------------------------------------------------------------
@jax.jit
def vgg_block(x_nchw, params, eps=1e-5):
    n, cin, h, w = x_nchw.shape
    hw = h * w
    assert hw % 128 == 0, "flattened H*W must be lane-tile aligned"
    cmid = params["w1"].shape[-1]
    cout = params["w2"].shape[-1]

    x = x_nchw.reshape(n, cin, hw)                    # metadata-only reshape
    # HWIO (3,3,Ci,Co) -> (9, Co, Ci), tap-major to match the in-kernel loop.
    w1k = params["w1"].transpose(0, 1, 3, 2).reshape(9, cmid, cin)
    w2k = params["w2"].transpose(0, 1, 3, 2).reshape(9, cout, cmid)
    g1 = params["g1"].reshape(cmid, 1).astype(jnp.float32)
    bt1 = params["bt1"].reshape(cmid, 1).astype(jnp.float32)
    g2 = params["g2"].reshape(cout, 1).astype(jnp.float32)
    bt2 = params["bt2"].reshape(cout, 1).astype(jnp.float32)
    # params["b1"] / params["b2"] intentionally unused: conv bias followed by
    # training-mode BatchNorm is cancelled exactly by the mean subtraction.

    kernel = functools.partial(_vgg_block_kernel, n=n, h=h, w=w, eps=float(eps))
    out = pl.pallas_call(
        kernel,
        out_shape=jax.ShapeDtypeStruct((n, cout, hw), jnp.float32),
        in_specs=[pl.BlockSpec(memory_space=pltpu.MemorySpace.VMEM)
                  for _ in range(7)],
        out_specs=pl.BlockSpec(memory_space=pltpu.MemorySpace.VMEM),
    )(x, w1k, w2k, g1, bt1, g2, bt2)
    return out.reshape(n, cout, h, w)


# ---------------------------------------------------------------------------
# Pure-JAX reference (keeps the conv biases — verifies the cancellation)
# ---------------------------------------------------------------------------
def ref_vgg_block(x_nchw, p, eps=1e-5):
    def conv(x, wgt, b):
        y = jax.lax.conv_general_dilated(
            x, wgt, (1, 1), "SAME",
            dimension_numbers=("NCHW", "HWIO", "NCHW"))
        return y + b.reshape(1, -1, 1, 1)

    def bn_relu(y, g, bt):
        m = jnp.mean(y, axis=(0, 2, 3), keepdims=True)
        v = jnp.var(y, axis=(0, 2, 3), keepdims=True)
        yn = (y - m) * (g.reshape(1, -1, 1, 1) * jax.lax.rsqrt(v + eps))
        return jnp.maximum(yn + bt.reshape(1, -1, 1, 1), 0.0)

    y = bn_relu(conv(x_nchw, p["w1"], p["b1"]), p["g1"], p["bt1"])
    y = bn_relu(conv(y, p["w2"], p["b2"]), p["g2"], p["bt2"])
    return y


if __name__ == "__main__":
    # VGGBlock(in_channels=4, middle_channels=8, out_channels=4)
    N, Cin, H, W = 2, 4, 16, 16
    Cmid, Cout = 8, 4

    key = jax.random.PRNGKey(0)
    k = jax.random.split(key, 7)
    x = jax.random.normal(k[0], (N, Cin, H, W), dtype=jnp.float32)

    params = {
        # Conv weights stored HWIO (3,3,Cin,Cout); PyTorch layout would be
        # (Cout,Cin,3,3) — same parameters, transposed storage.
        "w1": 0.2 * jax.random.normal(k[1], (3, 3, Cin, Cmid), jnp.float32),
        "b1": 0.1 * jax.random.normal(k[2], (Cmid,), jnp.float32),
        "g1": 1.0 + 0.1 * jax.random.normal(k[3], (Cmid,), jnp.float32),
        "bt1": 0.1 * jax.random.normal(k[4], (Cmid,), jnp.float32),
        "w2": 0.2 * jax.random.normal(k[5], (3, 3, Cmid, Cout), jnp.float32),
        "b2": 0.1 * jax.random.normal(k[6], (Cout,), jnp.float32),
        "g2": jnp.ones((Cout,), jnp.float32),
        "bt2": jnp.zeros((Cout,), jnp.float32),
    }

    out = jax.block_until_ready(vgg_block(x, params))
    ref = jax.block_until_ready(ref_vgg_block(x, params))

    assert out.shape == (N, Cout, H, W), out.shape
    err = float(jnp.max(jnp.abs(out - ref)))
    assert jnp.allclose(out, ref, rtol=1e-3, atol=1e-3), err
    print("KERNEL_OK")
</pallas_src>

<mosaic_0001>
module attributes {stable_mosaic.version = 11 : i64} {
  func.func @_vgg_block_kernel(%arg0: memref<2x4x256xf32, #tpu.memory_space<vmem>>, %arg1: memref<9x8x4xf32, #tpu.memory_space<vmem>>, %arg2: memref<9x4x8xf32, #tpu.memory_space<vmem>>, %arg3: memref<8x1xf32, #tpu.memory_space<vmem>>, %arg4: memref<8x1xf32, #tpu.memory_space<vmem>>, %arg5: memref<4x1xf32, #tpu.memory_space<vmem>>, %arg6: memref<4x1xf32, #tpu.memory_space<vmem>>, %arg7: memref<2x4x256xf32, #tpu.memory_space<vmem>>) attributes {dimension_semantics = [], scalar_prefetch = 0 : i64, scratch_operands = 0 : i64, tpu.core_type = #tpu.core_type<tc>} {
    %0 = tpu.iota {dimensions = array<i32: 1>} : vector<1x256xi32>
    %c15_i32 = arith.constant 15 : i32
    %1 = vector.broadcast %c15_i32 : i32 to vector<1x256xi32>
    %2 = arith.andi %0, %1 : vector<1x256xi32>
    %c16_i32 = arith.constant 16 : i32
    %3 = vector.broadcast %c16_i32 : i32 to vector<1x256xi32>
    %4 = arith.cmpi sge, %0, %3 : vector<1x256xi32>
    %c240_i32 = arith.constant 240 : i32
    %5 = vector.broadcast %c240_i32 : i32 to vector<1x256xi32>
    %6 = arith.cmpi slt, %0, %5 : vector<1x256xi32>
    %c1_i32 = arith.constant 1 : i32
    %7 = vector.broadcast %c1_i32 : i32 to vector<1x256xi32>
    %8 = arith.cmpi sge, %2, %7 : vector<1x256xi32>
    %c14_i32 = arith.constant 14 : i32
    %9 = vector.broadcast %c14_i32 : i32 to vector<1x256xi32>
    %10 = arith.cmpi sle, %2, %9 : vector<1x256xi32>
    %11 = arith.andi %4, %8 : vector<1x256xi1>
    %12 = arith.andi %4, %10 : vector<1x256xi1>
    %13 = arith.andi %6, %8 : vector<1x256xi1>
    %14 = arith.andi %6, %10 : vector<1x256xi1>
    %c0 = arith.constant 0 : index
    %c0_0 = arith.constant 0 : index
    %c0_1 = arith.constant 0 : index
    %15 = vector.load %arg1[%c0, %c0_0, %c0_1] : memref<9x8x4xf32, #tpu.memory_space<vmem>>, vector<9x8x4xf32>
    %c0_2 = arith.constant 0 : index
    %c0_3 = arith.constant 0 : index
    %c0_4 = arith.constant 0 : index
    %16 = vector.load %arg2[%c0_2, %c0_3, %c0_4] : memref<9x4x8xf32, #tpu.memory_space<vmem>>, vector<9x4x8xf32>
    %cst = arith.constant 0.000000e+00 : f32
    %17 = vector.broadcast %cst : f32 to vector<8x1xf32>
    %cst_5 = arith.constant 0.000000e+00 : f32
    %18 = vector.broadcast %cst_5 : f32 to vector<8x1xf32>
    %c0_6 = arith.constant 0 : index
    %c0_7 = arith.constant 0 : index
    %c0_8 = arith.constant 0 : index
    %19 = vector.load %arg0[%c0_6, %c0_7, %c0_8] : memref<2x4x256xf32, #tpu.memory_space<vmem>>, vector<1x4x256xf32>
    %20 = vector.shape_cast %19 : vector<1x4x256xf32> to vector<4x256xf32>
    %c17_i32 = arith.constant 17 : i32
    %21 = tpu.dynamic_rotate %20 by %c17_i32 dim 1 : vector<4x256xf32>, i32 -> vector<4x256xf32>
    %cst_9 = arith.constant 0.000000e+00 : f32
    %22 = vector.shape_cast %11 : vector<1x256xi1> to vector<1x256xi1>
    %23 = vector.broadcast %22 : vector<1x256xi1> to vector<4x256xi1>
    %24 = vector.broadcast %cst_9 : f32 to vector<4x256xf32>
    %25 = arith.select %23, %21, %24 : vector<4x256xi1>, vector<4x256xf32>
    %26 = vector.extract_strided_slice %15 {offsets = [0, 0, 0], sizes = [1, 8, 4], strides = [1, 1, 1]} : vector<9x8x4xf32> to vector<1x8x4xf32>
    %27 = vector.shape_cast %26 : vector<1x8x4xf32> to vector<8x4xf32>
    %cst_10 = arith.constant dense<0.000000e+00> : vector<8x256xf32>
    %28 = tpu.matmul %27, %25, %cst_10 {dimension_numbers = #tpu.dot_dimension_numbers<[1], [0], [0], [1], [0, 0, 1, 1], [], []>} : vector<8x4xf32>, vector<4x256xf32>, vector<8x256xf32> -> vector<8x256xf32>
    %c16_i32_11 = arith.constant 16 : i32
    %29 = tpu.dynamic_rotate %20 by %c16_i32_11 dim 1 : vector<4x256xf32>, i32 -> vector<4x256xf32>
    %cst_12 = arith.constant 0.000000e+00 : f32
    %30 = vector.shape_cast %4 : vector<1x256xi1> to vector<1x256xi1>
    %31 = vector.broadcast %30 : vector<1x256xi1> to vector<4x256xi1>
    %32 = vector.broadcast %cst_12 : f32 to vector<4x256xf32>
    %33 = arith.select %31, %29, %32 : vector<4x256xi1>, vector<4x256xf32>
    %34 = vector.extract_strided_slice %15 {offsets = [1, 0, 0], sizes = [1, 8, 4], strides = [1, 1, 1]} : vector<9x8x4xf32> to vector<1x8x4xf32>
    %35 = vector.shape_cast %34 : vector<1x8x4xf32> to vector<8x4xf32>
    %cst_13 = arith.constant dense<0.000000e+00> : vector<8x256xf32>
    %36 = tpu.matmul %35, %33, %cst_13 {dimension_numbers = #tpu.dot_dimension_numbers<[1], [0], [0], [1], [0, 0, 1, 1], [], []>} : vector<8x4xf32>, vector<4x256xf32>, vector<8x256xf32> -> vector<8x256xf32>
    %37 = arith.addf %28, %36 : vector<8x256xf32>
    %c15_i32_14 = arith.constant 15 : i32
    %38 = tpu.dynamic_rotate %20 by %c15_i32_14 dim 1 : vector<4x256xf32>, i32 -> vector<4x256xf32>
    %cst_15 = arith.constant 0.000000e+00 : f32
    %39 = vector.shape_cast %12 : vector<1x256xi1> to vector<1x256xi1>
    %40 = vector.broadcast %39 : vector<1x256xi1> to vector<4x256xi1>
    %41 = vector.broadcast %cst_15 : f32 to vector<4x256xf32>
    %42 = arith.select %40, %38, %41 : vector<4x256xi1>, vector<4x256xf32>
    %43 = vector.extract_strided_slice %15 {offsets = [2, 0, 0], sizes = [1, 8, 4], strides = [1, 1, 1]} : vector<9x8x4xf32> to vector<1x8x4xf32>
    %44 = vector.shape_cast %43 : vector<1x8x4xf32> to vector<8x4xf32>
    %cst_16 = arith.constant dense<0.000000e+00> : vector<8x256xf32>
    %45 = tpu.matmul %44, %42, %cst_16 {dimension_numbers = #tpu.dot_dimension_numbers<[1], [0], [0], [1], [0, 0, 1, 1], [], []>} : vector<8x4xf32>, vector<4x256xf32>, vector<8x256xf32> -> vector<8x256xf32>
    %46 = arith.addf %37, %45 : vector<8x256xf32>
    %c1_i32_17 = arith.constant 1 : i32
    %47 = tpu.dynamic_rotate %20 by %c1_i32_17 dim 1 : vector<4x256xf32>, i32 -> vector<4x256xf32>
    %cst_18 = arith.constant 0.000000e+00 : f32
    %48 = vector.shape_cast %8 : vector<1x256xi1> to vector<1x256xi1>
    %49 = vector.broadcast %48 : vector<1x256xi1> to vector<4x256xi1>
    %50 = vector.broadcast %cst_18 : f32 to vector<4x256xf32>
    %51 = arith.select %49, %47, %50 : vector<4x256xi1>, vector<4x256xf32>
    %52 = vector.extract_strided_slice %15 {offsets = [3, 0, 0], sizes = [1, 8, 4], strides = [1, 1, 1]} : vector<9x8x4xf32> to vector<1x8x4xf32>
    %53 = vector.shape_cast %52 : vector<1x8x4xf32> to vector<8x4xf32>
    %cst_19 = arith.constant dense<0.000000e+00> : vector<8x256xf32>
    %54 = tpu.matmul %53, %51, %cst_19 {dimension_numbers = #tpu.dot_dimension_numbers<[1], [0], [0], [1], [0, 0, 1, 1], [], []>} : vector<8x4xf32>, vector<4x256xf32>, vector<8x256xf32> -> vector<8x256xf32>
    %55 = arith.addf %46, %54 : vector<8x256xf32>
    %56 = vector.extract_strided_slice %15 {offsets = [4, 0, 0], sizes = [1, 8, 4], strides = [1, 1, 1]} : vector<9x8x4xf32> to vector<1x8x4xf32>
    %57 = vector.shape_cast %56 : vector<1x8x4xf32> to vector<8x4xf32>
    %cst_20 = arith.constant dense<0.000000e+00> : vector<8x256xf32>
    %58 = tpu.matmul %57, %20, %cst_20 {dimension_numbers = #tpu.dot_dimension_numbers<[1], [0], [0], [1], [0, 0, 1, 1], [], []>} : vector<8x4xf32>, vector<4x256xf32>, vector<8x256xf32> -> vector<8x256xf32>
    %59 = arith.addf %55, %58 : vector<8x256xf32>
    %c255_i32 = arith.constant 255 : i32
    %60 = tpu.dynamic_rotate %20 by %c255_i32 dim 1 : vector<4x256xf32>, i32 -> vector<4x256xf32>
    %cst_21 = arith.constant 0.000000e+00 : f32
    %61 = vector.shape_cast %10 : vector<1x256xi1> to vector<1x256xi1>
    %62 = vector.broadcast %61 : vector<1x256xi1> to vector<4x256xi1>
    %63 = vector.broadcast %cst_21 : f32 to vector<4x256xf32>
    %64 = arith.select %62, %60, %63 : vector<4x256xi1>, vector<4x256xf32>
    %65 = vector.extract_strided_slice %15 {offsets = [5, 0, 0], sizes = [1, 8, 4], strides = [1, 1, 1]} : vector<9x8x4xf32> to vector<1x8x4xf32>
    %66 = vector.shape_cast %65 : vector<1x8x4xf32> to vector<8x4xf32>
    %cst_22 = arith.constant dense<0.000000e+00> : vector<8x256xf32>
    %67 = tpu.matmul %66, %64, %cst_22 {dimension_numbers = #tpu.dot_dimension_numbers<[1], [0], [0], [1], [0, 0, 1, 1], [], []>} : vector<8x4xf32>, vector<4x256xf32>, vector<8x256xf32> -> vector<8x256xf32>
    %68 = arith.addf %59, %67 : vector<8x256xf32>
    %c241_i32 = arith.constant 241 : i32
    %69 = tpu.dynamic_rotate %20 by %c241_i32 dim 1 : vector<4x256xf32>, i32 -> vector<4x256xf32>
    %cst_23 = arith.constant 0.000000e+00 : f32
    %70 = vector.shape_cast %13 : vector<1x256xi1> to vector<1x256xi1>
    %71 = vector.broadcast %70 : vector<1x256xi1> to vector<4x256xi1>
    %72 = vector.broadcast %cst_23 : f32 to vector<4x256xf32>
    %73 = arith.select %71, %69, %72 : vector<4x256xi1>, vector<4x256xf32>
    %74 = vector.extract_strided_slice %15 {offsets = [6, 0, 0], sizes = [1, 8, 4], strides = [1, 1, 1]} : vector<9x8x4xf32> to vector<1x8x4xf32>
    %75 = vector.shape_cast %74 : vector<1x8x4xf32> to vector<8x4xf32>
    %cst_24 = arith.constant dense<0.000000e+00> : vector<8x256xf32>
    %76 = tpu.matmul %75, %73, %cst_24 {dimension_numbers = #tpu.dot_dimension_numbers<[1], [0], [0], [1], [0, 0, 1, 1], [], []>} : vector<8x4xf32>, vector<4x256xf32>, vector<8x256xf32> -> vector<8x256xf32>
    %77 = arith.addf %68, %76 : vector<8x256xf32>
    %c240_i32_25 = arith.constant 240 : i32
    %78 = tpu.dynamic_rotate %20 by %c240_i32_25 dim 1 : vector<4x256xf32>, i32 -> vector<4x256xf32>
    %cst_26 = arith.constant 0.000000e+00 : f32
    %79 = vector.shape_cast %6 : vector<1x256xi1> to vector<1x256xi1>
    %80 = vector.broadcast %79 : vector<1x256xi1> to vector<4x256xi1>
    %81 = vector.broadcast %cst_26 : f32 to vector<4x256xf32>
    %82 = arith.select %80, %78, %81 : vector<4x256xi1>, vector<4x256xf32>
    %83 = vector.extract_strided_slice %15 {offsets = [7, 0, 0], sizes = [1, 8, 4], strides = [1, 1, 1]} : vector<9x8x4xf32> to vector<1x8x4xf32>
    %84 = vector.shape_cast %83 : vector<1x8x4xf32> to vector<8x4xf32>
    %cst_27 = arith.constant dense<0.000000e+00> : vector<8x256xf32>
    %85 = tpu.matmul %84, %82, %cst_27 {dimension_numbers = #tpu.dot_dimension_numbers<[1], [0], [0], [1], [0, 0, 1, 1], [], []>} : vector<8x4xf32>, vector<4x256xf32>, vector<8x256xf32> -> vector<8x256xf32>
    %86 = arith.addf %77, %85 : vector<8x256xf32>
    %c239_i32 = arith.constant 239 : i32
    %87 = tpu.dynamic_rotate %20 by %c239_i32 dim 1 : vector<4x256xf32>, i32 -> vector<4x256xf32>
    %cst_28 = arith.constant 0.000000e+00 : f32
    %88 = vector.shape_cast %14 : vector<1x256xi1> to vector<1x256xi1>
    %89 = vector.broadcast %88 : vector<1x256xi1> to vector<4x256xi1>
    %90 = vector.broadcast %cst_28 : f32 to vector<4x256xf32>
    %91 = arith.select %89, %87, %90 : vector<4x256xi1>, vector<4x256xf32>
    %92 = vector.extract_strided_slice %15 {offsets = [8, 0, 0], sizes = [1, 8, 4], strides = [1, 1, 1]} : vector<9x8x4xf32> to vector<1x8x4xf32>
    %93 = vector.shape_cast %92 : vector<1x8x4xf32> to vector<8x4xf32>
    %cst_29 = arith.constant dense<0.000000e+00> : vector<8x256xf32>
    %94 = tpu.matmul %93, %91, %cst_29 {dimension_numbers = #tpu.dot_dimension_numbers<[1], [0], [0], [1], [0, 0, 1, 1], [], []>} : vector<8x4xf32>, vector<4x256xf32>, vector<8x256xf32> -> vector<8x256xf32>
    %95 = arith.addf %86, %94 : vector<8x256xf32>
    %cst_30 = arith.constant dense<0.000000e+00> : vector<8xf32>
    %96 = vector.multi_reduction <add>, %95, %cst_30 [1] : vector<8x256xf32> to vector<8xf32>
    %97 = vector.shape_cast %96 : vector<8xf32> to vector<8x1xf32>
    %98 = arith.addf %17, %97 : vector<8x1xf32>
    %99 = arith.mulf %95, %95 : vector<8x256xf32>
    %cst_31 = arith.constant dense<0.000000e+00> : vector<8xf32>
    %100 = vector.multi_reduction <add>, %99, %cst_31 [1] : vector<8x256xf32> to vector<8xf32>
    %101 = vector.shape_cast %100 : vector<8xf32> to vector<8x1xf32>
    %102 = arith.addf %18, %101 : vector<8x1xf32>
    %c1 = arith.constant 1 : index
    %c0_32 = arith.constant 0 : index
    %c0_33 = arith.constant 0 : index
    %103 = vector.load %arg0[%c1, %c0_32, %c0_33] : memref<2x4x256xf32, #tpu.memory_space<vmem>>, vector<1x4x256xf32>
    %104 = vector.shape_cast %103 : vector<1x4x256xf32> to vector<4x256xf32>
    %c17_i32_34 = arith.constant 17 : i32
    %105 = tpu.dynamic_rotate %104 by %c17_i32_34 dim 1 : vector<4x256xf32>, i32 -> vector<4x256xf32>
    %cst_35 = arith.constant 0.000000e+00 : f32
    %106 = vector.shape_cast %11 : vector<1x256xi1> to vector<1x256xi1>
    %107 = vector.broadcast %106 : vector<1x256xi1> to vector<4x256xi1>
    %108 = vector.broadcast %cst_35 : f32 to vector<4x256xf32>
    %109 = arith.select %107, %105, %108 : vector<4x256xi1>, vector<4x256xf32>
    %110 = vector.extract_strided_slice %15 {offsets = [0, 0, 0], sizes = [1, 8, 4], strides = [1, 1, 1]} : vector<9x8x4xf32> to vector<1x8x4xf32>
    %111 = vector.shape_cast %110 : vector<1x8x4xf32> to vector<8x4xf32>
    %cst_36 = arith.constant dense<0.000000e+00> : vector<8x256xf32>
    %112 = tpu.matmul %111, %109, %cst_36 {dimension_numbers = #tpu.dot_dimension_numbers<[1], [0], [0], [1], [0, 0, 1, 1], [], []>} : vector<8x4xf32>, vector<4x256xf32>, vector<8x256xf32> -> vector<8x256xf32>
    %c16_i32_37 = arith.constant 16 : i32
    %113 = tpu.dynamic_rotate %104 by %c16_i32_37 dim 1 : vector<4x256xf32>, i32 -> vector<4x256xf32>
    %cst_38 = arith.constant 0.000000e+00 : f32
    %114 = vector.shape_cast %4 : vector<1x256xi1> to vector<1x256xi1>
    %115 = vector.broadcast %114 : vector<1x256xi1> to vector<4x256xi1>
    %116 = vector.broadcast %cst_38 : f32 to vector<4x256xf32>
    %117 = arith.select %115, %113, %116 : vector<4x256xi1>, vector<4x256xf32>
    %118 = vector.extract_strided_slice %15 {offsets = [1, 0, 0], sizes = [1, 8, 4], strides = [1, 1, 1]} : vector<9x8x4xf32> to vector<1x8x4xf32>
    %119 = vector.shape_cast %118 : vector<1x8x4xf32> to vector<8x4xf32>
    %cst_39 = arith.constant dense<0.000000e+00> : vector<8x256xf32>
    %120 = tpu.matmul %119, %117, %cst_39 {dimension_numbers = #tpu.dot_dimension_numbers<[1], [0], [0], [1], [0, 0, 1, 1], [], []>} : vector<8x4xf32>, vector<4x256xf32>, vector<8x256xf32> -> vector<8x256xf32>
    %121 = arith.addf %112, %120 : vector<8x256xf32>
    %c15_i32_40 = arith.constant 15 : i32
    %122 = tpu.dynamic_rotate %104 by %c15_i32_40 dim 1 : vector<4x256xf32>, i32 -> vector<4x256xf32>
    %cst_41 = arith.constant 0.000000e+00 : f32
    %123 = vector.shape_cast %12 : vector<1x256xi1> to vector<1x256xi1>
    %124 = vector.broadcast %123 : vector<1x256xi1> to vector<4x256xi1>
    %125 = vector.broadcast %cst_41 : f32 to vector<4x256xf32>
    %126 = arith.select %124, %122, %125 : vector<4x256xi1>, vector<4x256xf32>
    %127 = vector.extract_strided_slice %15 {offsets = [2, 0, 0], sizes = [1, 8, 4], strides = [1, 1, 1]} : vector<9x8x4xf32> to vector<1x8x4xf32>
    %128 = vector.shape_cast %127 : vector<1x8x4xf32> to vector<8x4xf32>
    %cst_42 = arith.constant dense<0.000000e+00> : vector<8x256xf32>
    %129 = tpu.matmul %128, %126, %cst_42 {dimension_numbers = #tpu.dot_dimension_numbers<[1], [0], [0], [1], [0, 0, 1, 1], [], []>} : vector<8x4xf32>, vector<4x256xf32>, vector<8x256xf32> -> vector<8x256xf32>
    %130 = arith.addf %121, %129 : vector<8x256xf32>
    %c1_i32_43 = arith.constant 1 : i32
    %131 = tpu.dynamic_rotate %104 by %c1_i32_43 dim 1 : vector<4x256xf32>, i32 -> vector<4x256xf32>
    %cst_44 = arith.constant 0.000000e+00 : f32
    %132 = vector.shape_cast %8 : vector<1x256xi1> to vector<1x256xi1>
    %133 = vector.broadcast %132 : vector<1x256xi1> to vector<4x256xi1>
    %134 = vector.broadcast %cst_44 : f32 to vector<4x256xf32>
    %135 = arith.select %133, %131, %134 : vector<4x256xi1>, vector<4x256xf32>
    %136 = vector.extract_strided_slice %15 {offsets = [3, 0, 0], sizes = [1, 8, 4], strides = [1, 1, 1]} : vector<9x8x4xf32> to vector<1x8x4xf32>
    %137 = vector.shape_cast %136 : vector<1x8x4xf32> to vector<8x4xf32>
    %cst_45 = arith.constant dense<0.000000e+00> : vector<8x256xf32>
    %138 = tpu.matmul %137, %135, %cst_45 {dimension_numbers = #tpu.dot_dimension_numbers<[1], [0], [0], [1], [0, 0, 1, 1], [], []>} : vector<8x4xf32>, vector<4x256xf32>, vector<8x256xf32> -> vector<8x256xf32>
    %139 = arith.addf %130, %138 : vector<8x256xf32>
    %140 = vector.extract_strided_slice %15 {offsets = [4, 0, 0], sizes = [1, 8, 4], strides = [1, 1, 1]} : vector<9x8x4xf32> to vector<1x8x4xf32>
    %141 = vector.shape_cast %140 : vector<1x8x4xf32> to vector<8x4xf32>
    %cst_46 = arith.constant dense<0.000000e+00> : vector<8x256xf32>
    %142 = tpu.matmul %141, %104, %cst_46 {dimension_numbers = #tpu.dot_dimension_numbers<[1], [0], [0], [1], [0, 0, 1, 1], [], []>} : vector<8x4xf32>, vector<4x256xf32>, vector<8x256xf32> -> vector<8x256xf32>
    %143 = arith.addf %139, %142 : vector<8x256xf32>
    %c255_i32_47 = arith.constant 255 : i32
    %144 = tpu.dynamic_rotate %104 by %c255_i32_47 dim 1 : vector<4x256xf32>, i32 -> vector<4x256xf32>
    %cst_48 = arith.constant 0.000000e+00 : f32
    %145 = vector.shape_cast %10 : vector<1x256xi1> to vector<1x256xi1>
    %146 = vector.broadcast %145 : vector<1x256xi1> to vector<4x256xi1>
    %147 = vector.broadcast %cst_48 : f32 to vector<4x256xf32>
    %148 = arith.select %146, %144, %147 : vector<4x256xi1>, vector<4x256xf32>
    %149 = vector.extract_strided_slice %15 {offsets = [5, 0, 0], sizes = [1, 8, 4], strides = [1, 1, 1]} : vector<9x8x4xf32> to vector<1x8x4xf32>
    %150 = vector.shape_cast %149 : vector<1x8x4xf32> to vector<8x4xf32>
    %cst_49 = arith.constant dense<0.000000e+00> : vector<8x256xf32>
    %151 = tpu.matmul %150, %148, %cst_49 {dimension_numbers = #tpu.dot_dimension_numbers<[1], [0], [0], [1], [0, 0, 1, 1], [], []>} : vector<8x4xf32>, vector<4x256xf32>, vector<8x256xf32> -> vector<8x256xf32>
    %152 = arith.addf %143, %151 : vector<8x256xf32>
    %c241_i32_50 = arith.constant 241 : i32
    %153 = tpu.dynamic_rotate %104 by %c241_i32_50 dim 1 : vector<4x256xf32>, i32 -> vector<4x256xf32>
    %cst_51 = arith.constant 0.000000e+00 : f32
    %154 = vector.shape_cast %13 : vector<1x256xi1> to vector<1x256xi1>
    %155 = vector.broadcast %154 : vector<1x256xi1> to vector<4x256xi1>
    %156 = vector.broadcast %cst_51 : f32 to vector<4x256xf32>
    %157 = arith.select %155, %153, %156 : vector<4x256xi1>, vector<4x256xf32>
    %158 = vector.extract_strided_slice %15 {offsets = [6, 0, 0], sizes = [1, 8, 4], strides = [1, 1, 1]} : vector<9x8x4xf32> to vector<1x8x4xf32>
    %159 = vector.shape_cast %158 : vector<1x8x4xf32> to vector<8x4xf32>
    %cst_52 = arith.constant dense<0.000000e+00> : vector<8x256xf32>
    %160 = tpu.matmul %159, %157, %cst_52 {dimension_numbers = #tpu.dot_dimension_numbers<[1], [0], [0], [1], [0, 0, 1, 1], [], []>} : vector<8x4xf32>, vector<4x256xf32>, vector<8x256xf32> -> vector<8x256xf32>
    %161 = arith.addf %152, %160 : vector<8x256xf32>
    %c240_i32_53 = arith.constant 240 : i32
    %162 = tpu.dynamic_rotate %104 by %c240_i32_53 dim 1 : vector<4x256xf32>, i32 -> vector<4x256xf32>
    %cst_54 = arith.constant 0.000000e+00 : f32
    %163 = vector.shape_cast %6 : vector<1x256xi1> to vector<1x256xi1>
    %164 = vector.broadcast %163 : vector<1x256xi1> to vector<4x256xi1>
    %165 = vector.broadcast %cst_54 : f32 to vector<4x256xf32>
    %166 = arith.select %164, %162, %165 : vector<4x256xi1>, vector<4x256xf32>
    %167 = vector.extract_strided_slice %15 {offsets = [7, 0, 0], sizes = [1, 8, 4], strides = [1, 1, 1]} : vector<9x8x4xf32> to vector<1x8x4xf32>
    %168 = vector.shape_cast %167 : vector<1x8x4xf32> to vector<8x4xf32>
    %cst_55 = arith.constant dense<0.000000e+00> : vector<8x256xf32>
    %169 = tpu.matmul %168, %166, %cst_55 {dimension_numbers = #tpu.dot_dimension_numbers<[1], [0], [0], [1], [0, 0, 1, 1], [], []>} : vector<8x4xf32>, vector<4x256xf32>, vector<8x256xf32> -> vector<8x256xf32>
    %170 = arith.addf %161, %169 : vector<8x256xf32>
    %c239_i32_56 = arith.constant 239 : i32
    %171 = tpu.dynamic_rotate %104 by %c239_i32_56 dim 1 : vector<4x256xf32>, i32 -> vector<4x256xf32>
    %cst_57 = arith.constant 0.000000e+00 : f32
    %172 = vector.shape_cast %14 : vector<1x256xi1> to vector<1x256xi1>
    %173 = vector.broadcast %172 : vector<1x256xi1> to vector<4x256xi1>
    %174 = vector.broadcast %cst_57 : f32 to vector<4x256xf32>
    %175 = arith.select %173, %171, %174 : vector<4x256xi1>, vector<4x256xf32>
    %176 = vector.extract_strided_slice %15 {offsets = [8, 0, 0], sizes = [1, 8, 4], strides = [1, 1, 1]} : vector<9x8x4xf32> to vector<1x8x4xf32>
    %177 = vector.shape_cast %176 : vector<1x8x4xf32> to vector<8x4xf32>
    %cst_58 = arith.constant dense<0.000000e+00> : vector<8x256xf32>
    %178 = tpu.matmul %177, %175, %cst_58 {dimension_numbers = #tpu.dot_dimension_numbers<[1], [0], [0], [1], [0, 0, 1, 1], [], []>} : vector<8x4xf32>, vector<4x256xf32>, vector<8x256xf32> -> vector<8x256xf32>
    %179 = arith.addf %170, %178 : vector<8x256xf32>
    %cst_59 = arith.constant dense<0.000000e+00> : vector<8xf32>
    %180 = vector.multi_reduction <add>, %179, %cst_59 [1] : vector<8x256xf32> to vector<8xf32>
    %181 = vector.shape_cast %180 : vector<8xf32> to vector<8x1xf32>
    %182 = arith.addf %98, %181 : vector<8x1xf32>
    %183 = arith.mulf %179, %179 : vector<8x256xf32>
    %cst_60 = arith.constant dense<0.000000e+00> : vector<8xf32>
    %184 = vector.multi_reduction <add>, %183, %cst_60 [1] : vector<8x256xf32> to vector<8xf32>
    %185 = vector.shape_cast %184 : vector<8xf32> to vector<8x1xf32>
    %186 = arith.addf %102, %185 : vector<8x1xf32>
    %c0_61 = arith.constant 0 : index
    %c0_62 = arith.constant 0 : index
    %187 = vector.load %arg3[%c0_61, %c0_62] : memref<8x1xf32, #tpu.memory_space<vmem>>, vector<8x1xf32>
    %c0_63 = arith.constant 0 : index
    %c0_64 = arith.constant 0 : index
    %188 = vector.load %arg4[%c0_63, %c0_64] : memref<8x1xf32, #tpu.memory_space<vmem>>, vector<8x1xf32>
    %cst_65 = arith.constant 0.001953125 : f32
    %189 = vector.broadcast %cst_65 : f32 to vector<8x1xf32>
    %190 = arith.mulf %182, %189 : vector<8x1xf32>
    %cst_66 = arith.constant 0.001953125 : f32
    %191 = vector.broadcast %cst_66 : f32 to vector<8x1xf32>
    %192 = arith.mulf %186, %191 : vector<8x1xf32>
    %193 = arith.mulf %190, %190 : vector<8x1xf32>
    %194 = arith.subf %192, %193 : vector<8x1xf32>
    %cst_67 = arith.constant 9.99999974E-6 : f32
    %195 = vector.broadcast %cst_67 : f32 to vector<8x1xf32>
    %196 = arith.addf %194, %195 : vector<8x1xf32>
    %197 = math.rsqrt %196 : vector<8x1xf32>
    %198 = arith.mulf %187, %197 : vector<8x1xf32>
    %199 = arith.mulf %190, %198 : vector<8x1xf32>
    %200 = arith.subf %188, %199 : vector<8x1xf32>
    %cst_68 = arith.constant 0.000000e+00 : f32
    %201 = vector.broadcast %cst_68 : f32 to vector<4x1xf32>
    %cst_69 = arith.constant 0.000000e+00 : f32
    %202 = vector.broadcast %cst_69 : f32 to vector<4x1xf32>
    %203 = vector.broadcast %198 : vector<8x1xf32> to vector<8x256xf32>
    %204 = arith.mulf %95, %203 : vector<8x256xf32>
    %205 = vector.broadcast %200 : vector<8x1xf32> to vector<8x256xf32>
    %206 = arith.addf %204, %205 : vector<8x256xf32>
    %cst_70 = arith.constant 0.000000e+00 : f32
    %207 = vector.broadcast %cst_70 : f32 to vector<8x256xf32>
    %208 = arith.maximumf %206, %207 : vector<8x256xf32>
    %c17_i32_71 = arith.constant 17 : i32
    %209 = tpu.dynamic_rotate %208 by %c17_i32_71 dim 1 : vector<8x256xf32>, i32 -> vector<8x256xf32>
    %cst_72 = arith.constant 0.000000e+00 : f32
    %210 = vector.shape_cast %11 : vector<1x256xi1> to vector<1x256xi1>
    %211 = vector.broadcast %210 : vector<1x256xi1> to vector<8x256xi1>
    %212 = vector.broadcast %cst_72 : f32 to vector<8x256xf32>
    %213 = arith.select %211, %209, %212 : vector<8x256xi1>, vector<8x256xf32>
    %214 = vector.extract_strided_slice %16 {offsets = [0, 0, 0], sizes = [1, 4, 8], strides = [1, 1, 1]} : vector<9x4x8xf32> to vector<1x4x8xf32>
    %215 = vector.shape_cast %214 : vector<1x4x8xf32> to vector<4x8xf32>
    %cst_73 = arith.constant dense<0.000000e+00> : vector<4x256xf32>
    %216 = tpu.matmul %215, %213, %cst_73 {dimension_numbers = #tpu.dot_dimension_numbers<[1], [0], [0], [1], [0, 0, 1, 1], [], []>} : vector<4x8xf32>, vector<8x256xf32>, vector<4x256xf32> -> vector<4x256xf32>
    %c16_i32_74 = arith.constant 16 : i32
    %217 = tpu.dynamic_rotate %208 by %c16_i32_74 dim 1 : vector<8x256xf32>, i32 -> vector<8x256xf32>
    %cst_75 = arith.constant 0.000000e+00 : f32
    %218 = vector.shape_cast %4 : vector<1x256xi1> to vector<1x256xi1>
    %219 = vector.broadcast %218 : vector<1x256xi1> to vector<8x256xi1>
    %220 = vector.broadcast %cst_75 : f32 to vector<8x256xf32>
    %221 = arith.select %219, %217, %220 : vector<8x256xi1>, vector<8x256xf32>
    %222 = vector.extract_strided_slice %16 {offsets = [1, 0, 0], sizes = [1, 4, 8], strides = [1, 1, 1]} : vector<9x4x8xf32> to vector<1x4x8xf32>
    %223 = vector.shape_cast %222 : vector<1x4x8xf32> to vector<4x8xf32>
    %cst_76 = arith.constant dense<0.000000e+00> : vector<4x256xf32>
    %224 = tpu.matmul %223, %221, %cst_76 {dimension_numbers = #tpu.dot_dimension_numbers<[1], [0], [0], [1], [0, 0, 1, 1], [], []>} : vector<4x8xf32>, vector<8x256xf32>, vector<4x256xf32> -> vector<4x256xf32>
    %225 = arith.addf %216, %224 : vector<4x256xf32>
    %c15_i32_77 = arith.constant 15 : i32
    %226 = tpu.dynamic_rotate %208 by %c15_i32_77 dim 1 : vector<8x256xf32>, i32 -> vector<8x256xf32>
    %cst_78 = arith.constant 0.000000e+00 : f32
    %227 = vector.shape_cast %12 : vector<1x256xi1> to vector<1x256xi1>
    %228 = vector.broadcast %227 : vector<1x256xi1> to vector<8x256xi1>
    %229 = vector.broadcast %cst_78 : f32 to vector<8x256xf32>
    %230 = arith.select %228, %226, %229 : vector<8x256xi1>, vector<8x256xf32>
    %231 = vector.extract_strided_slice %16 {offsets = [2, 0, 0], sizes = [1, 4, 8], strides = [1, 1, 1]} : vector<9x4x8xf32> to vector<1x4x8xf32>
    %232 = vector.shape_cast %231 : vector<1x4x8xf32> to vector<4x8xf32>
    %cst_79 = arith.constant dense<0.000000e+00> : vector<4x256xf32>
    %233 = tpu.matmul %232, %230, %cst_79 {dimension_numbers = #tpu.dot_dimension_numbers<[1], [0], [0], [1], [0, 0, 1, 1], [], []>} : vector<4x8xf32>, vector<8x256xf32>, vector<4x256xf32> -> vector<4x256xf32>
    %234 = arith.addf %225, %233 : vector<4x256xf32>
    %c1_i32_80 = arith.constant 1 : i32
    %235 = tpu.dynamic_rotate %208 by %c1_i32_80 dim 1 : vector<8x256xf32>, i32 -> vector<8x256xf32>
    %cst_81 = arith.constant 0.000000e+00 : f32
    %236 = vector.shape_cast %8 : vector<1x256xi1> to vector<1x256xi1>
    %237 = vector.broadcast %236 : vector<1x256xi1> to vector<8x256xi1>
    %238 = vector.broadcast %cst_81 : f32 to vector<8x256xf32>
    %239 = arith.select %237, %235, %238 : vector<8x256xi1>, vector<8x256xf32>
    %240 = vector.extract_strided_slice %16 {offsets = [3, 0, 0], sizes = [1, 4, 8], strides = [1, 1, 1]} : vector<9x4x8xf32> to vector<1x4x8xf32>
    %241 = vector.shape_cast %240 : vector<1x4x8xf32> to vector<4x8xf32>
    %cst_82 = arith.constant dense<0.000000e+00> : vector<4x256xf32>
    %242 = tpu.matmul %241, %239, %cst_82 {dimension_numbers = #tpu.dot_dimension_numbers<[1], [0], [0], [1], [0, 0, 1, 1], [], []>} : vector<4x8xf32>, vector<8x256xf32>, vector<4x256xf32> -> vector<4x256xf32>
    %243 = arith.addf %234, %242 : vector<4x256xf32>
    %244 = vector.extract_strided_slice %16 {offsets = [4, 0, 0], sizes = [1, 4, 8], strides = [1, 1, 1]} : vector<9x4x8xf32> to vector<1x4x8xf32>
    %245 = vector.shape_cast %244 : vector<1x4x8xf32> to vector<4x8xf32>
    %cst_83 = arith.constant dense<0.000000e+00> : vector<4x256xf32>
    %246 = tpu.matmul %245, %208, %cst_83 {dimension_numbers = #tpu.dot_dimension_numbers<[1], [0], [0], [1], [0, 0, 1, 1], [], []>} : vector<4x8xf32>, vector<8x256xf32>, vector<4x256xf32> -> vector<4x256xf32>
    %247 = arith.addf %243, %246 : vector<4x256xf32>
    %c255_i32_84 = arith.constant 255 : i32
    %248 = tpu.dynamic_rotate %208 by %c255_i32_84 dim 1 : vector<8x256xf32>, i32 -> vector<8x256xf32>
    %cst_85 = arith.constant 0.000000e+00 : f32
    %249 = vector.shape_cast %10 : vector<1x256xi1> to vector<1x256xi1>
    %250 = vector.broadcast %249 : vector<1x256xi1> to vector<8x256xi1>
    %251 = vector.broadcast %cst_85 : f32 to vector<8x256xf32>
    %252 = arith.select %250, %248, %251 : vector<8x256xi1>, vector<8x256xf32>
    %253 = vector.extract_strided_slice %16 {offsets = [5, 0, 0], sizes = [1, 4, 8], strides = [1, 1, 1]} : vector<9x4x8xf32> to vector<1x4x8xf32>
    %254 = vector.shape_cast %253 : vector<1x4x8xf32> to vector<4x8xf32>
    %cst_86 = arith.constant dense<0.000000e+00> : vector<4x256xf32>
    %255 = tpu.matmul %254, %252, %cst_86 {dimension_numbers = #tpu.dot_dimension_numbers<[1], [0], [0], [1], [0, 0, 1, 1], [], []>} : vector<4x8xf32>, vector<8x256xf32>, vector<4x256xf32> -> vector<4x256xf32>
    %256 = arith.addf %247, %255 : vector<4x256xf32>
    %c241_i32_87 = arith.constant 241 : i32
    %257 = tpu.dynamic_rotate %208 by %c241_i32_87 dim 1 : vector<8x256xf32>, i32 -> vector<8x256xf32>
    %cst_88 = arith.constant 0.000000e+00 : f32
    %258 = vector.shape_cast %13 : vector<1x256xi1> to vector<1x256xi1>
    %259 = vector.broadcast %258 : vector<1x256xi1> to vector<8x256xi1>
    %260 = vector.broadcast %cst_88 : f32 to vector<8x256xf32>
    %261 = arith.select %259, %257, %260 : vector<8x256xi1>, vector<8x256xf32>
    %262 = vector.extract_strided_slice %16 {offsets = [6, 0, 0], sizes = [1, 4, 8], strides = [1, 1, 1]} : vector<9x4x8xf32> to vector<1x4x8xf32>
    %263 = vector.shape_cast %262 : vector<1x4x8xf32> to vector<4x8xf32>
    %cst_89 = arith.constant dense<0.000000e+00> : vector<4x256xf32>
    %264 = tpu.matmul %263, %261, %cst_89 {dimension_numbers = #tpu.dot_dimension_numbers<[1], [0], [0], [1], [0, 0, 1, 1], [], []>} : vector<4x8xf32>, vector<8x256xf32>, vector<4x256xf32> -> vector<4x256xf32>
    %265 = arith.addf %256, %264 : vector<4x256xf32>
    %c240_i32_90 = arith.constant 240 : i32
    %266 = tpu.dynamic_rotate %208 by %c240_i32_90 dim 1 : vector<8x256xf32>, i32 -> vector<8x256xf32>
    %cst_91 = arith.constant 0.000000e+00 : f32
    %267 = vector.shape_cast %6 : vector<1x256xi1> to vector<1x256xi1>
    %268 = vector.broadcast %267 : vector<1x256xi1> to vector<8x256xi1>
    %269 = vector.broadcast %cst_91 : f32 to vector<8x256xf32>
    %270 = arith.select %268, %266, %269 : vector<8x256xi1>, vector<8x256xf32>
    %271 = vector.extract_strided_slice %16 {offsets = [7, 0, 0], sizes = [1, 4, 8], strides = [1, 1, 1]} : vector<9x4x8xf32> to vector<1x4x8xf32>
    %272 = vector.shape_cast %271 : vector<1x4x8xf32> to vector<4x8xf32>
    %cst_92 = arith.constant dense<0.000000e+00> : vector<4x256xf32>
    %273 = tpu.matmul %272, %270, %cst_92 {dimension_numbers = #tpu.dot_dimension_numbers<[1], [0], [0], [1], [0, 0, 1, 1], [], []>} : vector<4x8xf32>, vector<8x256xf32>, vector<4x256xf32> -> vector<4x256xf32>
    %274 = arith.addf %265, %273 : vector<4x256xf32>
    %c239_i32_93 = arith.constant 239 : i32
    %275 = tpu.dynamic_rotate %208 by %c239_i32_93 dim 1 : vector<8x256xf32>, i32 -> vector<8x256xf32>
    %cst_94 = arith.constant 0.000000e+00 : f32
    %276 = vector.shape_cast %14 : vector<1x256xi1> to vector<1x256xi1>
    %277 = vector.broadcast %276 : vector<1x256xi1> to vector<8x256xi1>
    %278 = vector.broadcast %cst_94 : f32 to vector<8x256xf32>
    %279 = arith.select %277, %275, %278 : vector<8x256xi1>, vector<8x256xf32>
    %280 = vector.extract_strided_slice %16 {offsets = [8, 0, 0], sizes = [1, 4, 8], strides = [1, 1, 1]} : vector<9x4x8xf32> to vector<1x4x8xf32>
    %281 = vector.shape_cast %280 : vector<1x4x8xf32> to vector<4x8xf32>
    %cst_95 = arith.constant dense<0.000000e+00> : vector<4x256xf32>
    %282 = tpu.matmul %281, %279, %cst_95 {dimension_numbers = #tpu.dot_dimension_numbers<[1], [0], [0], [1], [0, 0, 1, 1], [], []>} : vector<4x8xf32>, vector<8x256xf32>, vector<4x256xf32> -> vector<4x256xf32>
    %283 = arith.addf %274, %282 : vector<4x256xf32>
    %cst_96 = arith.constant dense<0.000000e+00> : vector<4xf32>
    %284 = vector.multi_reduction <add>, %283, %cst_96 [1] : vector<4x256xf32> to vector<4xf32>
    %285 = vector.shape_cast %284 : vector<4xf32> to vector<4x1xf32>
    %286 = arith.addf %201, %285 : vector<4x1xf32>
    %287 = arith.mulf %283, %283 : vector<4x256xf32>
    %cst_97 = arith.constant dense<0.000000e+00> : vector<4xf32>
    %288 = vector.multi_reduction <add>, %287, %cst_97 [1] : vector<4x256xf32> to vector<4xf32>
    %289 = vector.shape_cast %288 : vector<4xf32> to vector<4x1xf32>
    %290 = arith.addf %202, %289 : vector<4x1xf32>
    %291 = vector.broadcast %198 : vector<8x1xf32> to vector<8x256xf32>
    %292 = arith.mulf %179, %291 : vector<8x256xf32>
    %293 = vector.broadcast %200 : vector<8x1xf32> to vector<8x256xf32>
    %294 = arith.addf %292, %293 : vector<8x256xf32>
    %cst_98 = arith.constant 0.000000e+00 : f32
    %295 = vector.broadcast %cst_98 : f32 to vector<8x256xf32>
    %296 = arith.maximumf %294, %295 : vector<8x256xf32>
    %c17_i32_99 = arith.constant 17 : i32
    %297 = tpu.dynamic_rotate %296 by %c17_i32_99 dim 1 : vector<8x256xf32>, i32 -> vector<8x256xf32>
    %cst_100 = arith.constant 0.000000e+00 : f32
    %298 = vector.shape_cast %11 : vector<1x256xi1> to vector<1x256xi1>
    %299 = vector.broadcast %298 : vector<1x256xi1> to vector<8x256xi1>
    %300 = vector.broadcast %cst_100 : f32 to vector<8x256xf32>
    %301 = arith.select %299, %297, %300 : vector<8x256xi1>, vector<8x256xf32>
    %302 = vector.extract_strided_slice %16 {offsets = [0, 0, 0], sizes = [1, 4, 8], strides = [1, 1, 1]} : vector<9x4x8xf32> to vector<1x4x8xf32>
    %303 = vector.shape_cast %302 : vector<1x4x8xf32> to vector<4x8xf32>
    %cst_101 = arith.constant dense<0.000000e+00> : vector<4x256xf32>
    %304 = tpu.matmul %303, %301, %cst_101 {dimension_numbers = #tpu.dot_dimension_numbers<[1], [0], [0], [1], [0, 0, 1, 1], [], []>} : vector<4x8xf32>, vector<8x256xf32>, vector<4x256xf32> -> vector<4x256xf32>
    %c16_i32_102 = arith.constant 16 : i32
    %305 = tpu.dynamic_rotate %296 by %c16_i32_102 dim 1 : vector<8x256xf32>, i32 -> vector<8x256xf32>
    %cst_103 = arith.constant 0.000000e+00 : f32
    %306 = vector.shape_cast %4 : vector<1x256xi1> to vector<1x256xi1>
    %307 = vector.broadcast %306 : vector<1x256xi1> to vector<8x256xi1>
    %308 = vector.broadcast %cst_103 : f32 to vector<8x256xf32>
    %309 = arith.select %307, %305, %308 : vector<8x256xi1>, vector<8x256xf32>
    %310 = vector.extract_strided_slice %16 {offsets = [1, 0, 0], sizes = [1, 4, 8], strides = [1, 1, 1]} : vector<9x4x8xf32> to vector<1x4x8xf32>
    %311 = vector.shape_cast %310 : vector<1x4x8xf32> to vector<4x8xf32>
    %cst_104 = arith.constant dense<0.000000e+00> : vector<4x256xf32>
    %312 = tpu.matmul %311, %309, %cst_104 {dimension_numbers = #tpu.dot_dimension_numbers<[1], [0], [0], [1], [0, 0, 1, 1], [], []>} : vector<4x8xf32>, vector<8x256xf32>, vector<4x256xf32> -> vector<4x256xf32>
    %313 = arith.addf %304, %312 : vector<4x256xf32>
    %c15_i32_105 = arith.constant 15 : i32
    %314 = tpu.dynamic_rotate %296 by %c15_i32_105 dim 1 : vector<8x256xf32>, i32 -> vector<8x256xf32>
    %cst_106 = arith.constant 0.000000e+00 : f32
    %315 = vector.shape_cast %12 : vector<1x256xi1> to vector<1x256xi1>
    %316 = vector.broadcast %315 : vector<1x256xi1> to vector<8x256xi1>
    %317 = vector.broadcast %cst_106 : f32 to vector<8x256xf32>
    %318 = arith.select %316, %314, %317 : vector<8x256xi1>, vector<8x256xf32>
    %319 = vector.extract_strided_slice %16 {offsets = [2, 0, 0], sizes = [1, 4, 8], strides = [1, 1, 1]} : vector<9x4x8xf32> to vector<1x4x8xf32>
    %320 = vector.shape_cast %319 : vector<1x4x8xf32> to vector<4x8xf32>
    %cst_107 = arith.constant dense<0.000000e+00> : vector<4x256xf32>
    %321 = tpu.matmul %320, %318, %cst_107 {dimension_numbers = #tpu.dot_dimension_numbers<[1], [0], [0], [1], [0, 0, 1, 1], [], []>} : vector<4x8xf32>, vector<8x256xf32>, vector<4x256xf32> -> vector<4x256xf32>
    %322 = arith.addf %313, %321 : vector<4x256xf32>
    %c1_i32_108 = arith.constant 1 : i32
    %323 = tpu.dynamic_rotate %296 by %c1_i32_108 dim 1 : vector<8x256xf32>, i32 -> vector<8x256xf32>
    %cst_109 = arith.constant 0.000000e+00 : f32
    %324 = vector.shape_cast %8 : vector<1x256xi1> to vector<1x256xi1>
    %325 = vector.broadcast %324 : vector<1x256xi1> to vector<8x256xi1>
    %326 = vector.broadcast %cst_109 : f32 to vector<8x256xf32>
    %327 = arith.select %325, %323, %326 : vector<8x256xi1>, vector<8x256xf32>
    %328 = vector.extract_strided_slice %16 {offsets = [3, 0, 0], sizes = [1, 4, 8], strides = [1, 1, 1]} : vector<9x4x8xf32> to vector<1x4x8xf32>
    %329 = vector.shape_cast %328 : vector<1x4x8xf32> to vector<4x8xf32>
    %cst_110 = arith.constant dense<0.000000e+00> : vector<4x256xf32>
    %330 = tpu.matmul %329, %327, %cst_110 {dimension_numbers = #tpu.dot_dimension_numbers<[1], [0], [0], [1], [0, 0, 1, 1], [], []>} : vector<4x8xf32>, vector<8x256xf32>, vector<4x256xf32> -> vector<4x256xf32>
    %331 = arith.addf %322, %330 : vector<4x256xf32>
    %332 = vector.extract_strided_slice %16 {offsets = [4, 0, 0], sizes = [1, 4, 8], strides = [1, 1, 1]} : vector<9x4x8xf32> to vector<1x4x8xf32>
    %333 = vector.shape_cast %332 : vector<1x4x8xf32> to vector<4x8xf32>
    %cst_111 = arith.constant dense<0.000000e+00> : vector<4x256xf32>
    %334 = tpu.matmul %333, %296, %cst_111 {dimension_numbers = #tpu.dot_dimension_numbers<[1], [0], [0], [1], [0, 0, 1, 1], [], []>} : vector<4x8xf32>, vector<8x256xf32>, vector<4x256xf32> -> vector<4x256xf32>
    %335 = arith.addf %331, %334 : vector<4x256xf32>
    %c255_i32_112 = arith.constant 255 : i32
    %336 = tpu.dynamic_rotate %296 by %c255_i32_112 dim 1 : vector<8x256xf32>, i32 -> vector<8x256xf32>
    %cst_113 = arith.constant 0.000000e+00 : f32
    %337 = vector.shape_cast %10 : vector<1x256xi1> to vector<1x256xi1>
    %338 = vector.broadcast %337 : vector<1x256xi1> to vector<8x256xi1>
    %339 = vector.broadcast %cst_113 : f32 to vector<8x256xf32>
    %340 = arith.select %338, %336, %339 : vector<8x256xi1>, vector<8x256xf32>
    %341 = vector.extract_strided_slice %16 {offsets = [5, 0, 0], sizes = [1, 4, 8], strides = [1, 1, 1]} : vector<9x4x8xf32> to vector<1x4x8xf32>
    %342 = vector.shape_cast %341 : vector<1x4x8xf32> to vector<4x8xf32>
    %cst_114 = arith.constant dense<0.000000e+00> : vector<4x256xf32>
    %343 = tpu.matmul %342, %340, %cst_114 {dimension_numbers = #tpu.dot_dimension_numbers<[1], [0], [0], [1], [0, 0, 1, 1], [], []>} : vector<4x8xf32>, vector<8x256xf32>, vector<4x256xf32> -> vector<4x256xf32>
    %344 = arith.addf %335, %343 : vector<4x256xf32>
    %c241_i32_115 = arith.constant 241 : i32
    %345 = tpu.dynamic_rotate %296 by %c241_i32_115 dim 1 : vector<8x256xf32>, i32 -> vector<8x256xf32>
    %cst_116 = arith.constant 0.000000e+00 : f32
    %346 = vector.shape_cast %13 : vector<1x256xi1> to vector<1x256xi1>
    %347 = vector.broadcast %346 : vector<1x256xi1> to vector<8x256xi1>
    %348 = vector.broadcast %cst_116 : f32 to vector<8x256xf32>
    %349 = arith.select %347, %345, %348 : vector<8x256xi1>, vector<8x256xf32>
    %350 = vector.extract_strided_slice %16 {offsets = [6, 0, 0], sizes = [1, 4, 8], strides = [1, 1, 1]} : vector<9x4x8xf32> to vector<1x4x8xf32>
    %351 = vector.shape_cast %350 : vector<1x4x8xf32> to vector<4x8xf32>
    %cst_117 = arith.constant dense<0.000000e+00> : vector<4x256xf32>
    %352 = tpu.matmul %351, %349, %cst_117 {dimension_numbers = #tpu.dot_dimension_numbers<[1], [0], [0], [1], [0, 0, 1, 1], [], []>} : vector<4x8xf32>, vector<8x256xf32>, vector<4x256xf32> -> vector<4x256xf32>
    %353 = arith.addf %344, %352 : vector<4x256xf32>
    %c240_i32_118 = arith.constant 240 : i32
    %354 = tpu.dynamic_rotate %296 by %c240_i32_118 dim 1 : vector<8x256xf32>, i32 -> vector<8x256xf32>
    %cst_119 = arith.constant 0.000000e+00 : f32
    %355 = vector.shape_cast %6 : vector<1x256xi1> to vector<1x256xi1>
    %356 = vector.broadcast %355 : vector<1x256xi1> to vector<8x256xi1>
    %357 = vector.broadcast %cst_119 : f32 to vector<8x256xf32>
    %358 = arith.select %356, %354, %357 : vector<8x256xi1>, vector<8x256xf32>
    %359 = vector.extract_strided_slice %16 {offsets = [7, 0, 0], sizes = [1, 4, 8], strides = [1, 1, 1]} : vector<9x4x8xf32> to vector<1x4x8xf32>
    %360 = vector.shape_cast %359 : vector<1x4x8xf32> to vector<4x8xf32>
    %cst_120 = arith.constant dense<0.000000e+00> : vector<4x256xf32>
    %361 = tpu.matmul %360, %358, %cst_120 {dimension_numbers = #tpu.dot_dimension_numbers<[1], [0], [0], [1], [0, 0, 1, 1], [], []>} : vector<4x8xf32>, vector<8x256xf32>, vector<4x256xf32> -> vector<4x256xf32>
    %362 = arith.addf %353, %361 : vector<4x256xf32>
    %c239_i32_121 = arith.constant 239 : i32
    %363 = tpu.dynamic_rotate %296 by %c239_i32_121 dim 1 : vector<8x256xf32>, i32 -> vector<8x256xf32>
    %cst_122 = arith.constant 0.000000e+00 : f32
    %364 = vector.shape_cast %14 : vector<1x256xi1> to vector<1x256xi1>
    %365 = vector.broadcast %364 : vector<1x256xi1> to vector<8x256xi1>
    %366 = vector.broadcast %cst_122 : f32 to vector<8x256xf32>
    %367 = arith.select %365, %363, %366 : vector<8x256xi1>, vector<8x256xf32>
    %368 = vector.extract_strided_slice %16 {offsets = [8, 0, 0], sizes = [1, 4, 8], strides = [1, 1, 1]} : vector<9x4x8xf32> to vector<1x4x8xf32>
    %369 = vector.shape_cast %368 : vector<1x4x8xf32> to vector<4x8xf32>
    %cst_123 = arith.constant dense<0.000000e+00> : vector<4x256xf32>
    %370 = tpu.matmul %369, %367, %cst_123 {dimension_numbers = #tpu.dot_dimension_numbers<[1], [0], [0], [1], [0, 0, 1, 1], [], []>} : vector<4x8xf32>, vector<8x256xf32>, vector<4x256xf32> -> vector<4x256xf32>
    %371 = arith.addf %362, %370 : vector<4x256xf32>
    %cst_124 = arith.constant dense<0.000000e+00> : vector<4xf32>
    %372 = vector.multi_reduction <add>, %371, %cst_124 [1] : vector<4x256xf32> to vector<4xf32>
    %373 = vector.shape_cast %372 : vector<4xf32> to vector<4x1xf32>
    %374 = arith.addf %286, %373 : vector<4x1xf32>
    %375 = arith.mulf %371, %371 : vector<4x256xf32>
    %cst_125 = arith.constant dense<0.000000e+00> : vector<4xf32>
    %376 = vector.multi_reduction <add>, %375, %cst_125 [1] : vector<4x256xf32> to vector<4xf32>
    %377 = vector.shape_cast %376 : vector<4xf32> to vector<4x1xf32>
    %378 = arith.addf %290, %377 : vector<4x1xf32>
    %c0_126 = arith.constant 0 : index
    %c0_127 = arith.constant 0 : index
    %379 = vector.load %arg5[%c0_126, %c0_127] : memref<4x1xf32, #tpu.memory_space<vmem>>, vector<4x1xf32>
    %c0_128 = arith.constant 0 : index
    %c0_129 = arith.constant 0 : index
    %380 = vector.load %arg6[%c0_128, %c0_129] : memref<4x1xf32, #tpu.memory_space<vmem>>, vector<4x1xf32>
    %cst_130 = arith.constant 0.001953125 : f32
    %381 = vector.broadcast %cst_130 : f32 to vector<4x1xf32>
    %382 = arith.mulf %374, %381 : vector<4x1xf32>
    %cst_131 = arith.constant 0.001953125 : f32
    %383 = vector.broadcast %cst_131 : f32 to vector<4x1xf32>
    %384 = arith.mulf %378, %383 : vector<4x1xf32>
    %385 = arith.mulf %382, %382 : vector<4x1xf32>
    %386 = arith.subf %384, %385 : vector<4x1xf32>
    %cst_132 = arith.constant 9.99999974E-6 : f32
    %387 = vector.broadcast %cst_132 : f32 to vector<4x1xf32>
    %388 = arith.addf %386, %387 : vector<4x1xf32>
    %389 = math.rsqrt %388 : vector<4x1xf32>
    %390 = arith.mulf %379, %389 : vector<4x1xf32>
    %391 = arith.mulf %382, %390 : vector<4x1xf32>
    %392 = arith.subf %380, %391 : vector<4x1xf32>
    %393 = vector.broadcast %390 : vector<4x1xf32> to vector<4x256xf32>
    %394 = arith.mulf %283, %393 : vector<4x256xf32>
    %395 = vector.broadcast %392 : vector<4x1xf32> to vector<4x256xf32>
    %396 = arith.addf %394, %395 : vector<4x256xf32>
    %cst_133 = arith.constant 0.000000e+00 : f32
    %397 = vector.broadcast %cst_133 : f32 to vector<4x256xf32>
    %398 = arith.maximumf %396, %397 : vector<4x256xf32>
    %c0_134 = arith.constant 0 : index
    %c0_135 = arith.constant 0 : index
    %c0_136 = arith.constant 0 : index
    %399 = vector.load %arg7[%c0_134, %c0_135, %c0_136] : memref<2x4x256xf32, #tpu.memory_space<vmem>>, vector<1x4x256xf32>
    %400 = vector.shape_cast %399 : vector<1x4x256xf32> to vector<4x256xf32>
    %401 = vector.shape_cast %398 : vector<4x256xf32> to vector<1x4x256xf32>
    tpu.vector_store %arg7[%c0_134, %c0_135, %c0_136], %401 {strides = array<i32>} : memref<2x4x256xf32, #tpu.memory_space<vmem>>, vector<1x4x256xf32>,
    %402 = vector.broadcast %390 : vector<4x1xf32> to vector<4x256xf32>
    %403 = arith.mulf %371, %402 : vector<4x256xf32>
    %404 = vector.broadcast %392 : vector<4x1xf32> to vector<4x256xf32>
    %405 = arith.addf %403, %404 : vector<4x256xf32>
    %cst_137 = arith.constant 0.000000e+00 : f32
    %406 = vector.broadcast %cst_137 : f32 to vector<4x256xf32>
    %407 = arith.maximumf %405, %406 : vector<4x256xf32>
    %c1_138 = arith.constant 1 : index
    %c0_139 = arith.constant 0 : index
    %c0_140 = arith.constant 0 : index
    %408 = vector.load %arg7[%c1_138, %c0_139, %c0_140] : memref<2x4x256xf32, #tpu.memory_space<vmem>>, vector<1x4x256xf32>
    %409 = vector.shape_cast %408 : vector<1x4x256xf32> to vector<4x256xf32>
    %410 = vector.shape_cast %407 : vector<4x256xf32> to vector<1x4x256xf32>
    tpu.vector_store %arg7[%c1_138, %c0_139, %c0_140], %410 {strides = array<i32>} : memref<2x4x256xf32, #tpu.memory_space<vmem>>, vector<1x4x256xf32>,
    return
  }
}

</mosaic_0001>

<bundles_post_ra>
// kernel: vgg_block.1
= control target key start
LH: loop header
LB: loop body
LE: loop exit
PB: predicated region body
PF: predicated region fallthrough
CT: control target
= control target key end

     0   :  { %s2412_s26 = smov 17   ;;  %s2413_s27 = smov 16   ;;  %v26_v32 = vlaneseq  ;;  %vm3227_vm5 = vcmask 1043456   ;;  %vm103_vm7 = vcmask 31744   ;;  %s3213_s0 = inlined_call_operand.vmem [shape: f32[2,4,256], index: 0, kind: input, shape index: {}]   ;;  %s3214_s1 = inlined_call_operand.vmem [shape: f32[9,8,4], index: 1, kind: input, shape index: {}]   ;;  %s3215_s3 = inlined_call_operand.vmem [shape: f32[8,1], index: 3, kind: input, shape index: {}]   ;;  %s3216_s4 = inlined_call_operand.vmem [shape: f32[8,1], index: 4, kind: input, shape index: {}]   ;;  %s3217_s2 = inlined_call_operand.vmem [shape: f32[9,4,8], index: 2, kind: input, shape index: {}]   ;;  %s3218_s5 = inlined_call_operand.vmem [shape: f32[4,1], index: 5, kind: input, shape index: {}]   ;;  %s3219_s6 = inlined_call_operand.vmem [shape: f32[4,1], index: 6, kind: input, shape index: {}]   ;;  %s3220_s7 = inlined_call_operand.vmem [shape: f32[2,4,256], index: 7, kind: output, shape index: {}]  }
   0x1   :  { %v65_v0 = vld [vmem:[%s3213_s0] sm:$0xff]  ;;  %s2414_s28 = smov 15   ;;  %s2415_s29 = smov 1   ;;  %v2485_v17 = vld [vmem:[%s3213_s0 + $0x8] sm:$0xff]  ;;  %v2582_v62 = vld [vmem:[%s3214_s1 + $0x18] sm:$0xff] }
   0x2   :  { %67 = vst [vmem:[#allocation1] ss:$2 sm:$0xff] %v65_v0  ;;  %s2416_s30 = smov 127   ;;  %s2417_s8 = smov 113   ;;  %v2509_v35 = vand.u32 127, %v26_v32  ;;  %v2545_v48 = vld [vmem:[%s3214_s1] sm:$0xff] }
   0x3   :  { %s2418_s9 = smov 112   ;;  %s2419_s12 = smov 111   ;;  %v2573_v59 = vld [vmem:[%s3214_s1 + $0x8] sm:$0xff]  ;;  %v2702_v32 = vld [vmem:[%s3214_s1 + $0x38] sm:$0xff] }
   0x4   :  { %v29_v36 = vand.u32 15, %v2509_v35  ;;  %v2513_v37 = vadd.s32 128, %v2509_v35  ;;  %vm3226_vm0 = vcmp.ge.s32.totalorder %v2509_v35, 16  ;;  %vm3228_vm2 = vcmp.lt.s32.totalorder %v2509_v35, 17 }
   0x5   :  { %vm3223_vm4 = vcmp.lt.s32.totalorder %v2509_v35, 1  ;;  %vm94_vm8 = vcmp.lt.s32.totalorder %v2509_v35, 16  ;;  %vm3225_vm10 = vcmp.lt.s32.totalorder %v2509_v35, 15  ;;  %vm3221_vm13 = vcmp.lt.s32.totalorder %v2509_v35, 127 }
   0x6   :  { %vm2516_vm1 = vcmp.ge.s32.totalorder %v29_v36, 1  ;;  %v30_v41 = vand.u32 15, %v2513_v37  ;;  %vm2592_vm9 = vcmp.le.s32.totalorder %v29_v36, 14  ;;  %vm34_vm14 = vcmp.lt.s32.totalorder %v2513_v37, 240 }
   0x7   :  { %vm2529_vm3 = vmand %vm3226_vm0, %vm2516_vm1  ;;  %vm3222_vm15 = vcmp.lt.s32.totalorder %v2509_v35, 113 }
   0x8   :  { %vm2534_vm6 = vcmp.ge.s32.totalorder %v30_v41, 1  ;;  %vm2608_vm11 = vmand %vm3226_vm0, %vm2592_vm9  ;;  %vm2612_vm12 = vcmp.le.s32.totalorder %v30_v41, 14 }
   0x9   :  { %v68_v1 = vld.sshfl [vmem:[#allocation1] sm:$0xff pattern:$0x75316420]  ;;  %v69_v2 = vld.sshfl [vmem:[#allocation1 + $0x8] sm:$0xff pattern:$0x75316420] }
   0xa   :  { %72 = vrot.lane.b32.xlu0 %v68_v1, %s2412_s26  ;;  %85 = vst [vmem:[#allocation1] ss:$2 sm:$0xff] %v65_v0 }
  0x11   :  { %v86_v3 = vld.sshfl [vmem:[#allocation1] sm:$0xff pattern:$0x75316420]  ;;  %v87_v4 = vld.sshfl [vmem:[#allocation1 + $0x8] sm:$0xff pattern:$0x75316420] }
  0x12   :  { %90 = vrot.lane.b32.xlu1 %v86_v3, %s2413_s27  ;;  %74 = vrot.lane.b32.xlu0 %v69_v2, %s2412_s26  ;;  %203 = vst [vmem:[#allocation1] ss:$2 sm:$0xff] %v65_v0 }
  0x19   :  { %v205_v5 = vld.sshfl [vmem:[#allocation1 + $0x8] sm:$0xff pattern:$0x75316420]  ;;  %v204_v6 = vld.sshfl [vmem:[#allocation1] sm:$0xff pattern:$0x75316420] }
  0x1a   :  { %92 = vrot.lane.b32.xlu1 %v87_v4, %s2413_s27  ;;  %208 = vrot.lane.b32.xlu0 %v204_v6, %s2414_s28  ;;  %272 = vst [vmem:[#allocation1] ss:$2 sm:$0xff] %v65_v0 }
  0x21   :  { %v273_v7 = vld.sshfl [vmem:[#allocation1] sm:$0xff pattern:$0x75316420]  ;;  %v274_v8 = vld.sshfl [vmem:[#allocation1 + $0x8] sm:$0xff pattern:$0x75316420] }
  0x22   :  { %210 = vrot.lane.b32.xlu1 %v205_v5, %s2414_s28  ;;  %341 = vst [vmem:[#allocation1] ss:$2 sm:$0xff] %v65_v0  ;;  %277 = vrot.lane.b32.xlu2 %v273_v7, %s2415_s29 }
  0x29   :  { %v2471_v9 = vld.sshfl [vmem:[#allocation1] sm:$0xff pattern:$0x75316420]  ;;  %v2473_v10 = vld.sshfl [vmem:[#allocation1 + $0x8] sm:$0xff pattern:$0x75316420] }
  0x2a   :  { %393 = vst [vmem:[#allocation1] ss:$2 sm:$0xff] %v65_v0  ;;  %279 = vrot.lane.b32.xlu2 %v274_v8, %s2415_s29 }
  0x31   :  { %v395_v11 = vld.sshfl [vmem:[#allocation1 + $0x8] sm:$0xff pattern:$0x75316420]  ;;  %v394_v12 = vld.sshfl [vmem:[#allocation1] sm:$0xff pattern:$0x75316420] }
  0x32   :  { %400 = vrot.lane.b32.xlu0 %v395_v11, %s2416_s30  ;;  %462 = vst [vmem:[#allocation1] ss:$2 sm:$0xff] %v65_v0  ;;  %398 = vrot.lane.b32.xlu2 %v394_v12, %s2416_s30  ;;  %v2623_v11 = vld [vmem:[%s3214_s1 + $0x10] sm:$0xff] }
  0x39   :  { %v464_v13 = vld.sshfl [vmem:[#allocation1 + $0x8] sm:$0xff pattern:$0x75316420]  ;;  %v463_v14 = vld.sshfl [vmem:[#allocation1] sm:$0xff pattern:$0x75316420] }
  0x3a   :  { %469 = vrot.lane.b32.xlu1 %v464_v13, %s2417_s8  ;;  %467 = vrot.lane.b32.xlu0 %v463_v14, %s2417_s8  ;;  %531 = vst [vmem:[#allocation1] ss:$2 sm:$0xff] %v65_v0  ;;  %v2643_v14 = vld [vmem:[%s3214_s1 + $0x20] sm:$0xff] }
  0x41   :  { %v532_v15 = vld.sshfl [vmem:[#allocation1] sm:$0xff pattern:$0x75316420]  ;;  %v533_v16 = vld.sshfl [vmem:[#allocation1 + $0x8] sm:$0xff pattern:$0x75316420] }
  0x42   :  { %536 = vrot.lane.b32.xlu1 %v532_v15, %s2418_s9  ;;  %600 = vst [vmem:[#allocation1] ss:$2 sm:$0xff] %v65_v0  ;;  %538 = vrot.lane.b32.xlu2 %v533_v16, %s2418_s9 }
  0x49   :  { %v601_v18 = vld.sshfl [vmem:[#allocation1] sm:$0xff pattern:$0x75316420]  ;;  %v602_v19 = vld.sshfl [vmem:[#allocation1 + $0x8] sm:$0xff pattern:$0x75316420] }
  0x4a   :  { %605 = vrot.lane.b32.xlu1 %v601_v18, %s2419_s12  ;;  %682 = vst [vmem:[#allocation1] ss:$2 sm:$0xff] %v2485_v17  ;;  %607 = vrot.lane.b32.xlu2 %v602_v19, %s2419_s12 }
  0x51   :  { %v683_v20 = vld.sshfl [vmem:[#allocation1] sm:$0xff pattern:$0x75316420]  ;;  %v684_v21 = vld.sshfl [vmem:[#allocation1 + $0x8] sm:$0xff pattern:$0x75316420] }
  0x52   :  { %695 = vst [vmem:[#allocation1] ss:$2 sm:$0xff] %v2485_v17 }
  0x59   :  { %v697_v22 = vld.sshfl [vmem:[#allocation1 + $0x8] sm:$0xff pattern:$0x75316420]  ;;  %v696_v23 = vld.sshfl [vmem:[#allocation1] sm:$0xff pattern:$0x75316420] }
  0x5a   :  { %702 = vrot.lane.b32.xlu0 %v697_v22, %s2413_s27  ;;  %800 = vst [vmem:[#allocation1] ss:$2 sm:$0xff] %v2485_v17  ;;  %700 = vrot.lane.b32.xlu2 %v696_v23, %s2413_s27 }
  0x61   :  { %v801_v24 = vld.sshfl [vmem:[#allocation1] sm:$0xff pattern:$0x75316420]  ;;  %v802_v25 = vld.sshfl [vmem:[#allocation1 + $0x8] sm:$0xff pattern:$0x75316420] }
  0x62   :  { %805 = vrot.lane.b32.xlu0 %v801_v24, %s2414_s28  ;;  %807 = vrot.lane.b32.xlu1 %v802_v25, %s2414_s28  ;;  %861 = vst [vmem:[#allocation1] ss:$2 sm:$0xff] %v2485_v17  ;;  %v2686_v25 = vld [vmem:[%s3214_s1 + $0x30] sm:$0xff] }
  0x63   :  { %687 = vrot.lane.b32.xlu2 %v683_v20, %s2412_s26 }
  0x69   :  { %v862_v26 = vld.sshfl [vmem:[#allocation1] sm:$0xff pattern:$0x75316420]  ;;  %v863_v27 = vld.sshfl [vmem:[#allocation1 + $0x8] sm:$0xff pattern:$0x75316420] }
  0x6a   :  { %689 = vrot.lane.b32.xlu0 %v684_v21, %s2412_s26  ;;  %866 = vrot.lane.b32.xlu1 %v862_v26, %s2415_s29  ;;  %922 = vst [vmem:[#allocation1] ss:$2 sm:$0xff] %v2485_v17 }
  0x6b   :  { %868 = vrot.lane.b32.xlu2 %v863_v27, %s2415_s29 }
  0x71   :  { %v2502_v28 = vld.sshfl [vmem:[#allocation1] sm:$0xff pattern:$0x75316420]  ;;  %v2504_v29 = vld.sshfl [vmem:[#allocation1 + $0x8] sm:$0xff pattern:$0x75316420] }
  0x72   :  { %971 = vst [vmem:[#allocation1] ss:$2 sm:$0xff] %v2485_v17 }
  0x79   :  { %v972_v30 = vld.sshfl [vmem:[#allocation1] sm:$0xff pattern:$0x75316420]  ;;  %v973_v31 = vld.sshfl [vmem:[#allocation1 + $0x8] sm:$0xff pattern:$0x75316420] }
  0x7a   :  { %1032 = vst [vmem:[#allocation1] ss:$2 sm:$0xff] %v2485_v17  ;;  %976 = vrot.lane.b32.xlu2 %v972_v30, %s2416_s30 }
  0x7c   :  { %v73_v33 = vpop.permute.xlu0 %72  ;;  %v278_v34 = vpop.permute.xlu2 %277 }
  0x81   :  { %v1033_v39 = vld.sshfl [vmem:[#allocation1] sm:$0xff pattern:$0x75316420]  ;;  %v1034_v40 = vld.sshfl [vmem:[#allocation1 + $0x8] sm:$0xff pattern:$0x75316420] }
  0x82   :  { %1037 = vrot.lane.b32.xlu0 %v1033_v39, %s2417_s8  ;;  %1039 = vrot.lane.b32.xlu1 %v1034_v40, %s2417_s8  ;;  %1093 = vst [vmem:[#allocation1] ss:$2 sm:$0xff] %v2485_v17 }
  0x84   :  { %v91_v43 = vpop.permute.xlu1 %90  ;;  %v75_v44 = vpop.permute.xlu0 %74 }
  0x85   :  { %v78_v46 = vsel %vm3228_vm2, %v75_v44, %v73_v33  ;;  %v77_v47 = vsel %vm3228_vm2, %v73_v33, %v75_v44  ;;  %v280_v49 = vpop.permute.xlu2 %279 }
  0x86   :  { %v83_v50 = vsel %vm2529_vm3, %v78_v46, 0.0  ;;  %v84_v51 = vsel %vm2534_vm6, %v77_v47, 0.0  ;;  %v282_v52 = vsel %vm3223_vm4, %v278_v34, %v280_v49  ;;  %v283_v53 = vsel %vm3223_vm4, %v280_v49, %v278_v34  ;;  %v2732_v46 = vld [vmem:[%s3214_s1 + $0x40] sm:$0xff] }
  0x87   :  { %2262 = vmatpush.msk.msra.mxu2 %vm3227_vm5, %v83_v50  ;;  %2264 = vmatpush.msk.msra.mxu3 %vm3227_vm5, %v84_v51  ;;  %v288_v54 = vsel %vm2516_vm1, %v283_v53, 0.0  ;;  %v289_v55 = vsel %vm2534_vm6, %v282_v52, 0.0  ;;  %vm609_vm4 = vcmp.lt.s32.totalorder %v2509_v35, 111 }
  0x88   :  { %2263 = vmatmul.msk.f32.vlgmr.msra.gmra.mxu2 %vm103_vm7, %v2545_v48  ;;  %2265 = vmatmul.msk.f32.vlgmr.msra.gmra.mxu3 %vm103_vm7, %v2545_v48 }
  0x89   :  { %v1094_v56 = vld.sshfl [vmem:[#allocation1] sm:$0xff pattern:$0x75316420]  ;;  %v1095_v57 = vld.sshfl [vmem:[#allocation1 + $0x8] sm:$0xff pattern:$0x75316420]  ;;  %2270 = vmatpush.msk.msrb.mxu2 %vm3227_vm5, %v288_v54  ;;  %2272 = vmatpush.msk.msrb.mxu3 %vm3227_vm5, %v289_v55 }
  0x8a   :  { %1154 = vst [vmem:[#allocation1] ss:$2 sm:$0xff] %v2485_v17  ;;  %978 = vrot.lane.b32.xlu0 %v973_v31, %s2416_s30  ;;  %v2657_v17 = vld [vmem:[%s3214_s1 + $0x28] sm:$0xff] }
  0x8c   :  { %v93_v58 = vpop.permute.xlu1 %92  ;;  %v209_v3 = vpop.permute.xlu0 %208 }
  0x8d   :  { %v96_v60 = vsel %vm94_vm8, %v93_v58, %v91_v43  ;;  %v95_v61 = vsel %vm94_vm8, %v91_v43, %v93_v58  ;;  %v399_v15 = vpop.permute.xlu2 %398 }
  0x8e   :  { %v101_v63 = vsel %vm3226_vm0, %v96_v60, 0.0  ;;  %2260 = vmatpush.msk.msra.mxu1 %vm3227_vm5, %v95_v61 }
  0x8f   :  { %2258 = vmatpush.msk.msra.mxu0 %vm3227_vm5, %v101_v63  ;;  %2261 = vmatmul.msk.f32.vlgmr.msra.gmra.mxu1 %vm103_vm7, %v2573_v59 }
  0x90   :  { %2259 = vmatmul.msk.f32.vlgmr.msra.gmra.mxu0 %vm103_vm7, %v2573_v59  ;;  %2271 = vmatmul.msk.f32.vlgmr.msrb.gmra.mxu2 %vm103_vm7, %v2582_v62 }
  0x91   :  { %v1155_v1 = vld.sshfl [vmem:[#allocation1] sm:$0xff pattern:$0x75316420]  ;;  %v1156_v2 = vld.sshfl [vmem:[#allocation1 + $0x8] sm:$0xff pattern:$0x75316420]  ;;  %2273 = vmatmul.msk.f32.vlgmr.msrb.gmra.mxu3 %vm103_vm7, %v2582_v62 }
  0x92   :  { %1159 = vrot.lane.b32.xlu1 %v1155_v1, %s2419_s12  ;;  %1098 = vrot.lane.b32.xlu0 %v1094_v56, %s2418_s9 }
  0x93   :  { %1161 = vrot.lane.b32.xlu2 %v1156_v2, %s2419_s12 }
  0x94   :  { %v211_v6 = vpop.permute.xlu1 %210 }
  0x95   :  { %v213_v7 = vsel %vm3225_vm10, %v209_v3, %v211_v6  ;;  %v214_v8 = vsel %vm3225_vm10, %v211_v6, %v209_v3 }
  0x96   :  { %v219_v12 = vsel %vm2608_vm11, %v214_v8, 0.0  ;;  %v220_v13 = vsel %vm2612_vm12, %v213_v7, 0.0 }
  0x97   :  { %2266 = vmatpush.msk.msrb.mxu0 %vm3227_vm5, %v219_v12  ;;  %2268 = vmatpush.msk.msrb.mxu1 %vm3227_vm5, %v220_v13 }
  0x98   :  { %2267 = vmatmul.msk.f32.vlgmr.msrb.gmra.mxu0 %vm103_vm7, %v2623_v11  ;;  %2269 = vmatmul.msk.f32.vlgmr.msrb.gmra.mxu1 %vm103_vm7, %v2623_v11 }
  0x99   :  { %2274 = vmatpush.msk.msra.mxu0 %vm3227_vm5, %v2471_v9  ;;  %2276 = vmatpush.msk.msra.mxu1 %vm3227_vm5, %v2473_v10 }
  0x9a   :  { %1100 = vrot.lane.b32.xlu1 %v1095_v57, %s2418_s9 }
  0x9c   :  { %v539_v30 = vpop.permute.xlu2 %538 }
  0xa0   :  { %2277 = vmatmul.msk.f32.vlgmr.msra.gmra.mxu1 %vm103_vm7, %v2643_v14  ;;  %2275 = vmatmul.msk.f32.vlgmr.msra.gmra.mxu0 %vm103_vm7, %v2643_v14 }
  0xa4   :  { %v401_v9 = vpop.permute.xlu0 %400  ;;  %v608_v40 = vpop.permute.xlu2 %607 }
  0xa5   :  { %v403_v10 = vsel %vm3221_vm13, %v399_v15, %v401_v9  ;;  %v404_v16 = vsel %vm3221_vm13, %v401_v9, %v399_v15  ;;  %vm2675_vm13 = vmand %vm34_vm14, %vm2534_vm6 }
  0xa6   :  { %v409_v18 = vsel %vm2592_vm9, %v403_v10, 0.0  ;;  %v410_v19 = vsel %vm2612_vm12, %v404_v16, 0.0 }
  0xa7   :  { %2278 = vmatpush.msk.msra.mxu2 %vm3227_vm5, %v409_v18  ;;  %2280 = vmatpush.msk.msra.mxu3 %vm3227_vm5, %v410_v19 }
  0xa8   :  { %2279 = vmatmul.msk.f32.vlgmr.msra.gmra.mxu2 %vm103_vm7, %v2657_v17  ;;  %2281 = vmatmul.msk.f32.vlgmr.msra.gmra.mxu3 %vm103_vm7, %v2657_v17 }
  0xac   :  { %v470_v21 = vpop.permute.xlu1 %469  ;;  %v468_v22 = vpop.permute.xlu0 %467 }
  0xad   :  { %v472_v23 = vsel %vm3222_vm15, %v468_v22, %v470_v21  ;;  %v473_v24 = vsel %vm3222_vm15, %v470_v21, %v468_v22  ;;  %vm3224_vm15 = vcmp.lt.s32.totalorder %v2509_v35, 112 }
  0xae   :  { %v478_v26 = vsel %vm2516_vm1, %v472_v23, 0.0  ;;  %v479_v27 = vsel %vm2675_vm13, %v473_v24, 0.0 }
  0xaf   :  { %2282 = vmatpush.msk.msrb.mxu0 %vm3227_vm5, %v478_v26  ;;  %2284 = vmatpush.msk.msrb.mxu1 %vm3227_vm5, %v479_v27 }
  0xb0   :  { %2285 = vmatmul.msk.f32.vlgmr.msrb.gmra.mxu1 %vm103_vm7, %v2686_v25  ;;  %2283 = vmatmul.msk.f32.vlgmr.msrb.gmra.mxu0 %vm103_vm7, %v2686_v25 }
  0xb4   :  { %v537_v31 = vpop.permute.xlu1 %536  ;;  %v701_v50 = vpop.permute.xlu2 %700 }
  0xb5   :  { %v541_v33 = vsel %vm3224_vm15, %v537_v31, %v539_v30  ;;  %v542_v34 = vsel %vm3224_vm15, %v539_v30, %v537_v31  ;;  %vm2721_vm15 = vmand %vm34_vm14, %vm2612_vm12 }
  0xb6   :  { %v548_v36 = vsel %vm34_vm14, %v542_v34, 0.0  ;;  %2286 = vmatpush.msk.msrb.mxu2 %vm3227_vm5, %v541_v33 }
  0xb7   :  { %2288 = vmatpush.msk.msrb.mxu3 %vm3227_vm5, %v548_v36  ;;  %2287 = vmatmul.msk.f32.vlgmr.msrb.gmra.mxu2 %vm103_vm7, %v2702_v32 }
  0xb8   :  { %2289 = vmatmul.msk.f32.vlgmr.msrb.gmra.mxu3 %vm103_vm7, %v2702_v32 }
  0xbc   :  { %v606_v41 = vpop.permute.xlu1 %605 }
  0xbd   :  { %v610_v43 = vsel %vm609_vm4, %v606_v41, %v608_v40  ;;  %v611_v44 = vsel %vm609_vm4, %v608_v40, %v606_v41  ;;  %v688_v55 = vpop.permute.xlu2 %687 }
  0xbe   :  { %v616_v47 = vsel %vm2592_vm9, %v610_v43, 0.0  ;;  %v617_v49 = vsel %vm2721_vm15, %v611_v44, 0.0 }
  0xbf   :  { %2290 = vmatpush.msk.msra.mxu0 %vm3227_vm5, %v616_v47  ;;  %2292 = vmatpush.msk.msra.mxu1 %vm3227_vm5, %v617_v49 }
  0xc0   :  { %2293 = vmatmul.msk.f32.vlgmr.msra.gmra.mxu1 %vm103_vm7, %v2732_v46  ;;  %2291 = vmatmul.msk.f32.vlgmr.msra.gmra.mxu0 %vm103_vm7, %v2732_v46 }
  0xcc   :  { %v703_v51 = vpop.permute.xlu0 %702 }
  0xcd   :  { %v704_v52 = vsel %vm94_vm8, %v701_v50, %v703_v51  ;;  %v705_v53 = vsel %vm94_vm8, %v703_v51, %v701_v50 }
  0xce   :  { %v706_v54 = vsel %vm3226_vm0, %v705_v53, 0.0  ;;  %2297 = vmatpush.msk.msra.mxu3 %vm3227_vm5, %v704_v52 }
  0xcf   :  { %2295 = vmatpush.msk.msra.mxu2 %vm3227_vm5, %v706_v54  ;;  %2298 = vmatmul.msk.f32.vlgmr.msra.gmra.mxu3 %vm103_vm7, %v2573_v59 }
  0xd0   :  { %2296 = vmatmul.msk.f32.vlgmr.msra.gmra.mxu2 %vm103_vm7, %v2573_v59  ;;  %v869_v59 = vpop.permute.xlu2 %868 }
  0xd4   :  { %v806_v56 = vpop.permute.xlu0 %805  ;;  %v808_v57 = vpop.permute.xlu1 %807 }
  0xd5   :  { %v809_v58 = vsel %vm3225_vm10, %v806_v56, %v808_v57  ;;  %v810_v60 = vsel %vm3225_vm10, %v808_v57, %v806_v56  ;;  %vm3245_vm10 = vcmp.lt.s32.totalorder %v2509_v35, 1 }
  0xd6   :  { %v811_v61 = vsel %vm2608_vm11, %v810_v60, 0.0  ;;  %v812_v63 = vsel %vm2612_vm12, %v809_v58, 0.0  ;;  %vm3246_vm0 = vmmov %vm3245_vm10 }
  0xd7   :  { %2303 = vmatpush.msk.msrb.mxu2 %vm3227_vm5, %v811_v61  ;;  %2305 = vmatpush.msk.msrb.mxu3 %vm3227_vm5, %v812_v63 }
  0xd8   :  { %2304 = vmatmul.msk.f32.vlgmr.msrb.gmra.mxu2 %vm103_vm7, %v2623_v11  ;;  %2306 = vmatmul.msk.f32.vlgmr.msrb.gmra.mxu3 %vm103_vm7, %v2623_v11  ;;  %v977_v16 = vpop.permute.xlu2 %976 }
  0xd9   :  { %2311 = vmatpush.msk.msra.mxu2 %vm3227_vm5, %v2502_v28  ;;  %2313 = vmatpush.msk.msra.mxu3 %vm3227_vm5, %v2504_v29 }
  0xdc   :  { %v690_v1 = vpop.permute.xlu0 %689  ;;  %v867_v2 = vpop.permute.xlu1 %866 }
  0xdd   :  { %v691_v3 = vsel %vm3228_vm2, %v688_v55, %v690_v1  ;;  %v692_v6 = vsel %vm3228_vm2, %v690_v1, %v688_v55  ;;  %v870_v7 = vsel %vm3245_vm10, %v867_v2, %v869_v59  ;;  %v871_v8 = vsel %vm3246_vm0, %v869_v59, %v867_v2 }
  0xde   :  { %v693_v28 = vsel %vm2529_vm3, %v692_v6, 0.0  ;;  %v694_v29 = vsel %vm2534_vm6, %v691_v3, 0.0  ;;  %v872_v11 = vsel %vm2516_vm1, %v871_v8, 0.0  ;;  %v873_v12 = vsel %vm2534_vm6, %v870_v7, 0.0 }
  0xdf   :  { %2299 = vmatpush.msk.msrb.mxu0 %vm3227_vm5, %v693_v28  ;;  %2301 = vmatpush.msk.msrb.mxu1 %vm3227_vm5, %v694_v29  ;;  %vm3247_vm0 = vcmp.lt.s32.totalorder %v2509_v35, 113 }
  0xe0   :  { %2300 = vmatmul.msk.f32.vlgmr.msrb.gmra.mxu0 %vm103_vm7, %v2545_v48  ;;  %2302 = vmatmul.msk.f32.vlgmr.msrb.gmra.mxu1 %vm103_vm7, %v2545_v48  ;;  %vm3248_vm10 = vmmov %vm3247_vm0 }
  0xe1   :  { %2312 = vmatmul.msk.f32.vlgmr.msra.gmra.mxu2 %vm103_vm7, %v2643_v14  ;;  %2314 = vmatmul.msk.f32.vlgmr.msra.gmra.mxu3 %vm103_vm7, %v2643_v14 }
  0xe2   :  { %2307 = vmatpush.msk.msra.mxu0 %vm3227_vm5, %v872_v11  ;;  %2309 = vmatpush.msk.msra.mxu1 %vm3227_vm5, %v873_v12 }
  0xe8   :  { %2308 = vmatmul.msk.f32.vlgmr.msra.gmra.mxu0 %vm103_vm7, %v2582_v62  ;;  %2310 = vmatmul.msk.f32.vlgmr.msra.gmra.mxu1 %vm103_vm7, %v2582_v62 }
  0xed   :  { %v1162_v23 = vpop.permute.xlu2 %1161 }
  0xf4   :  { %v1038_v13 = vpop.permute.xlu0 %1037  ;;  %v1040_v15 = vpop.permute.xlu1 %1039 }
  0xf5   :  { %v1041_v48 = vsel %vm3247_vm0, %v1038_v13, %v1040_v15  ;;  %v1042_v9 = vsel %vm3248_vm10, %v1040_v15, %v1038_v13  ;;  %vm3249_vm0 = vcmp.lt.s32.totalorder %v2509_v35, 127 }
  0xf6   :  { %v1043_v14 = vsel %vm2516_vm1, %v1041_v48, 0.0  ;;  %v1044_v10 = vsel %vm2675_vm13, %v1042_v9, 0.0  ;;  %vm3250_vm10 = vmmov %vm3249_vm0 }
  0xf7   :  { %2319 = vmatpush.msk.msrb.mxu2 %vm3227_vm5, %v1043_v14  ;;  %2321 = vmatpush.msk.msrb.mxu3 %vm3227_vm5, %v1044_v10 }
  0xf8   :  { %2322 = vmatmul.msk.f32.vlgmr.msrb.gmra.mxu3 %vm103_vm7, %v2686_v25  ;;  %2320 = vmatmul.msk.f32.vlgmr.msrb.gmra.mxu2 %vm103_vm7, %v2686_v25 }
  0xfc   :  { %v979_v62 = vpop.permute.xlu0 %978 }
  0xfd   :  { %v980_v18 = vsel %vm3249_vm0, %v977_v16, %v979_v62  ;;  %v981_v19 = vsel %vm3250_vm10, %v979_v62, %v977_v16  ;;  %vm3251_vm0 = vcmp.lt.s32.totalorder %v2509_v35, 112 }
  0xfe   :  { %v982_v21 = vsel %vm2592_vm9, %v980_v18, 0.0  ;;  %v983_v22 = vsel %vm2612_vm12, %v981_v19, 0.0  ;;  %vm3252_vm10 = vmmov %vm3251_vm0 }
  0xff   :  { %2315 = vmatpush.msk.msrb.mxu0 %vm3227_vm5, %v982_v21  ;;  %2317 = vmatpush.msk.msrb.mxu1 %vm3227_vm5, %v983_v22 }
 0x100   :  { %2316 = vmatmul.msk.f32.vlgmr.msrb.gmra.mxu0 %vm103_vm7, %v2657_v17  ;;  %2318 = vmatmul.msk.f32.vlgmr.msrb.gmra.mxu1 %vm103_vm7, %v2657_v17 }
 0x104   :  { %v1160_v24 = vpop.permute.xlu1 %1159  ;;  %v1099_v17 = vpop.permute.xlu0 %1098 }
 0x105   :  { %v1163_v25 = vsel %vm609_vm4, %v1160_v24, %v1162_v23  ;;  %v1164_v26 = vsel %vm609_vm4, %v1162_v23, %v1160_v24 }
 0x106   :  { %v1165_v27 = vsel %vm2592_vm9, %v1163_v25, 0.0  ;;  %v1166_v30 = vsel %vm2721_vm15, %v1164_v26, 0.0 }
 0x107   :  { %2327 = vmatpush.msk.msra.mxu2 %vm3227_vm5, %v1165_v27  ;;  %2329 = vmatpush.msk.msra.mxu3 %vm3227_vm5, %v1166_v30 }
 0x108   :  { %2328 = vmatmul.msk.f32.vlgmr.msra.gmra.mxu2 %vm103_vm7, %v2732_v46  ;;  %2330 = vmatmul.msk.f32.vlgmr.msra.gmra.mxu3 %vm103_vm7, %v2732_v46 }
 0x10b   :  { %v180_v43 = vpop.f32.mrf.mxu2  ;;  %v200_v44 = vpop.f32.mrf.mxu3 }
 0x10c   :  { %v1101_v31 = vpop.permute.xlu1 %1100  ;;  %v151_v41 = vpop.f32.mrf.mxu1 }
 0x10d   :  { %v1102_v33 = vsel %vm3251_vm0, %v1099_v17, %v1101_v31  ;;  %v1103_v34 = vsel %vm3252_vm10, %v1101_v31, %v1099_v17  ;;  %v131_v40 = vpop.f32.mrf.mxu0  ;;  %v201_v50 = vadd.f32 %v200_v44, %v151_v41 }
 0x10e   :  { %v1105_v36 = vsel %vm34_vm14, %v1103_v34, 0.0  ;;  %2323 = vmatpush.msk.msra.mxu0 %vm3227_vm5, %v1102_v33  ;;  %v181_v49 = vadd.f32 %v180_v43, %v131_v40 }
 0x10f   :  { %2324 = vmatmul.msk.f32.vlgmr.msra.gmra.mxu0 %vm103_vm7, %v2702_v32  ;;  %2325 = vmatpush.msk.msra.mxu1 %vm3227_vm5, %v1105_v36 }
 0x110   :  { %2326 = vmatmul.msk.f32.vlgmr.msra.gmra.mxu1 %vm103_vm7, %v2702_v32 }
 0x113   :  { %v316_v51 = vpop.f32.mrf.mxu2 }
 0x114   :  { %v336_v53 = vpop.f32.mrf.mxu3 }
 0x115   :  { %v247_v46 = vpop.f32.mrf.mxu0  ;;  %v267_v47 = vpop.f32.mrf.mxu1 }
 0x116   :  { %v270_v52 = vadd.f32 %v247_v46, %v181_v49  ;;  %v271_v54 = vadd.f32 %v267_v47, %v201_v50 }
 0x118   :  { %v339_v57 = vadd.f32 %v316_v51, %v270_v52  ;;  %v340_v58 = vadd.f32 %v336_v53, %v271_v54 }
 0x11d   :  { %v368_v55 = vpop.f32.mrf.mxu0  ;;  %v388_v56 = vpop.f32.mrf.mxu1 }
 0x11e   :  { %v391_v60 = vadd.f32 %v368_v55, %v339_v57  ;;  %v392_v61 = vadd.f32 %v388_v56, %v340_v58 }
 0x12b   :  { %v437_v63 = vpop.f32.mrf.mxu2  ;;  %v457_v32 = vpop.f32.mrf.mxu3 }
 0x12c   :  { %v460_v59 = vadd.f32 %v437_v63, %v391_v60  ;;  %v461_v3 = vadd.f32 %v457_v32, %v392_v61 }
 0x12d   :  { %v506_v1 = vpop.f32.mrf.mxu0  ;;  %v526_v2 = vpop.f32.mrf.mxu1 }
 0x12e   :  { %v529_v6 = vadd.f32 %v506_v1, %v460_v59  ;;  %v530_v7 = vadd.f32 %v526_v2, %v461_v3  ;;  %v2420_v2 = vmov 0  }
 0x12f   :  { %2405 = vset.pattern.permute.xlu2 %v2420_v2  ;;  %2406 = vset.pattern.permute.xlu0 %v2420_v2 }
 0x130   :  { %2407 = vset.pattern.permute.xlu1 %v2420_v2 }
 0x13a   :  { %v575_v8 = vpop.f32.mrf.mxu2 }
 0x13b   :  { %v598_v28 = vadd.f32 %v575_v8, %v529_v6  ;;  %v595_v29 = vpop.f32.mrf.mxu3 }
 0x13c   :  { %v599_v11 = vadd.f32 %v595_v29, %v530_v7 }
 0x13d   :  { %v644_v12 = vpop.f32.mrf.mxu0  ;;  %v664_v13 = vpop.f32.mrf.mxu1 }
 0x13e   :  { %v2860_v15 = vadd.f32 %v644_v12, %v598_v28  ;;  %v2862_v48 = vadd.f32 %v664_v13, %v599_v11 }
 0x140   :  { %v669_v9 = vadd.f32 %v2862_v48, %v2860_v15  ;;  %v673_v14 = vmul.f32 %v2860_v15, %v2860_v15  ;;  %v674_v10 = vmul.f32 %v2862_v48, %v2862_v48 }
 0x142   :  { %670 = vadd.xlane.f32.xlu2 %v669_v9  ;;  %v675_v16 = vadd.f32 %v674_v10, %v673_v14 }
 0x144   :  { %676 = vadd.xlane.f32.xlu1 %v675_v16 }
 0x152   :  { %v751_v18 = vpop.f32.mrf.mxu3 }
 0x153   :  { %v731_v62 = vpop.f32.mrf.mxu2 }
 0x15b   :  { %v836_v21 = vpop.f32.mrf.mxu2  ;;  %v856_v23 = vpop.f32.mrf.mxu3 }
 0x15d   :  { %v777_v19 = vpop.f32.mrf.mxu0  ;;  %v797_v22 = vpop.f32.mrf.mxu1 }
 0x15e   :  { %v778_v24 = vadd.f32 %v777_v19, %v731_v62  ;;  %v798_v25 = vadd.f32 %v797_v22, %v751_v18 }
 0x160   :  { %v859_v30 = vadd.f32 %v836_v21, %v778_v24  ;;  %v860_v33 = vadd.f32 %v856_v23, %v798_v25  ;;  %v1225_v21 = vld [vmem:[%s3215_s3] sm:$0xff] }
 0x161   :  { %v1226_v25 = vld [vmem:[%s3216_s4] sm:$0xff] }
 0x164   :  { %v946_v27 = vpop.f32.mrf.mxu2  ;;  %v966_v31 = vpop.f32.mrf.mxu3 }
 0x165   :  { %v897_v26 = vpop.f32.mrf.mxu0  ;;  %v917_v17 = vpop.f32.mrf.mxu1 }
 0x166   :  { %v920_v34 = vadd.f32 %v897_v26, %v859_v30  ;;  %v921_v36 = vadd.f32 %v917_v17, %v860_v33 }
 0x168   :  { %v969_v43 = vadd.f32 %v946_v27, %v920_v34  ;;  %v970_v47 = vadd.f32 %v966_v31, %v921_v36 }
 0x17b   :  { %v1068_v41 = vpop.f32.mrf.mxu2  ;;  %v1088_v46 = vpop.f32.mrf.mxu3 }
 0x17d   :  { %v1007_v40 = vpop.f32.mrf.mxu0  ;;  %v1027_v44 = vpop.f32.mrf.mxu1 }
 0x17e   :  { %v1030_v49 = vadd.f32 %v1007_v40, %v969_v43  ;;  %v1031_v50 = vadd.f32 %v1027_v44, %v970_v47 }
 0x180   :  { %v1091_v51 = vadd.f32 %v1068_v41, %v1030_v49  ;;  %v1092_v52 = vadd.f32 %v1088_v46, %v1031_v50 }
 0x18b   :  { %v1190_v54 = vpop.f32.mrf.mxu2  ;;  %v1210_v57 = vpop.f32.mrf.mxu3 }
 0x18c   :  { %v1129_v53 = vpop.f32.mrf.mxu0 }
 0x18d   :  { %v1152_v55 = vadd.f32 %v1129_v53, %v1091_v51  ;;  %v1149_v56 = vpop.f32.mrf.mxu1 }
 0x18e   :  { %v1153_v58 = vadd.f32 %v1149_v56, %v1092_v52 }
 0x18f   :  { %v2870_v60 = vadd.f32 %v1190_v54, %v1152_v55  ;;  %v2959_v54 = vld [vmem:[%s3217_s2] sm:$0xf] }
 0x190   :  { %v1214_v61 = vadd.f32 %v1210_v57, %v1153_v58 }
 0x191   :  { %v1219_v63 = vmul.f32 %v2870_v60, %v2870_v60 }
 0x192   :  { %v1215_v32 = vadd.f32 %v1214_v61, %v2870_v60  ;;  %v1220_v59 = vmul.f32 %v1214_v61, %v1214_v61 }
 0x194   :  { %1216 = vadd.xlane.f32.xlu0 %v1215_v32  ;;  %v1221_v1 = vadd.f32 %v1220_v59, %v1219_v63 }
 0x196   :  { %1222 = vadd.xlane.f32.xlu2 %v1221_v1 }
 0x1b5   :  { %v671_v3 = vpop.xlane.xlu2 %670 }
 0x1b7   :  { %v677_v8 = vpop.xlane.xlu1 %676 }
 0x207   :  { %v1217_v6 = vpop.xlane.xlu0 %1216 }
 0x208   :  { %v1218_v7 = vadd.f32 %v1217_v6, %v671_v3 }
 0x209   :  { %v1223_v28 = vpop.xlane.xlu2 %1222 }
 0x20a   :  { %v1227_v29 = vmul.f32 0.001953125, %v1218_v7  ;;  %v1224_v11 = vadd.f32 %v1223_v28, %v677_v8  ;;  %v2995_v7 = vld [vmem:[%s3217_s2 + $0xc] sm:$0xf] }
 0x20c   :  { %v1229_v12 = vmul.f32 %v1227_v29, %v1227_v29  ;;  %v1228_v13 = vmul.f32 0.001953125, %v1224_v11 }
 0x20e   :  { %v1230_v9 = vsub.f32 %v1228_v13, %v1229_v12  ;;  %v58_v12 = vld [vmem:[%s3217_s2 + $0x8] sm:$0xf] }
 0x210   :  { %v1231_v14 = vadd.f32 1e-05, %v1230_v9 }
 0x212   :  { %2408 = vrsqrt.f32 %v1231_v14  ;;  %vm1238_vm0 = vweird.f32 %v1231_v14 }
 0x218   :  { %v2409_v10 = vpop.eup %2408 }
 0x219   :  { %v1233_v16 = vmul.f32 %v2409_v10, %v1231_v14  ;;  %vm1239_vm7 = vweird.f32 %v2409_v10 }
 0x21a   :  { %vm1240_vm10 = vmor %vm1238_vm0, %vm1239_vm7  ;;  %vm1277_vm7 = vcmask 64512   ;;  %vm3253_vm0 = vcmp.ge.s32.totalorder %v2509_v35, 16 }
 0x21b   :  { %v1234_v62 = vmul.f32 %v2409_v10, %v1233_v16 }
 0x21d   :  { %v1235_v18 = vmul.f32 0.5, %v1234_v62  ;;  %v3040_v62 = vld [vmem:[%s3217_s2 + $0x10] sm:$0xf] }
 0x21f   :  { %v1236_v19 = vsub.f32 1.5, %v1235_v18 }
 0x221   :  { %v1237_v22 = vmul.f32 %v2409_v10, %v1236_v19 }
 0x223   :  { %v1241_v23 = vsel %vm1240_vm10, %v2409_v10, %v1237_v22  ;;  %vm3254_vm10 = vcmp.lt.s32.totalorder %v2509_v35, 1  ;;  %v3027_v10 = vld [vmem:[%s3217_s2 + $0x14] sm:$0xf]  ;;  %v3051_v22 = vld [vmem:[%s3217_s2 + $0x1c] sm:$0xf] }
 0x224   :  { %v1242_v24 = vmul.f32 %v1241_v23, %v1225_v21  ;;  %vm3255_vm5 = vmmov %vm3254_vm10 }
 0x226   :  { %1247 = vperm.xlu2 %2405, %v1242_v24   ;;  %v1243_v26 = vmul.f32 %v1242_v24, %v1227_v29 }
 0x228   :  { %v1244_v27 = vsub.f32 %v1226_v25, %v1243_v26 }
 0x22a   :  { %1254 = vperm.xlu0 %2406, %v1244_v27   ;;  %v62_v27 = vld [vmem:[%s3217_s2 + $0x18] sm:$0xf] }
 0x280   :  { %v1248_v30 = vpop.permute.xlu2 %1247 }
 0x281   :  { %v1250_v17 = vmul.f32 %v1248_v30, %v2860_v15  ;;  %v1251_v31 = vmul.f32 %v1248_v30, %v2862_v48  ;;  %v1742_v15 = vmul.f32 %v1248_v30, %v1214_v61  ;;  %v1741_v44 = vmul.f32 %v1248_v30, %v2870_v60  ;;  %v2976_v61 = vld [vmem:[%s3217_s2 + $0x4] sm:$0xf] }
 0x29c   :  { %v1255_v33 = vpop.permute.xlu0 %1254 }
 0x29d   :  { %v1257_v34 = vadd.f32 %v1255_v33, %v1250_v17  ;;  %v1258_v36 = vadd.f32 %v1255_v33, %v1251_v31  ;;  %v1744_v48 = vadd.f32 %v1742_v15, %v1255_v33  ;;  %v1743_v46 = vadd.f32 %v1741_v44, %v1255_v33 }
 0x29f   :  { %v2883_v40 = vmax.f32 %v1257_v34, 0.0  ;;  %v2885_v41 = vmax.f32 %v1258_v36, 0.0  ;;  %v2905_v43 = vmax.f32 %v1744_v48, 0.0  ;;  %v2914_v47 = vmax.f32 %v1743_v46, 0.0  ;;  %v64_v36 = vld [vmem:[%s3217_s2 + $0x20] sm:$0xf] }
 0x2a1   :  { %1263 = vrot.lane.b32.xlu2 %v2885_v41, %s2412_s26  ;;  %1364 = vrot.lane.b32.xlu0 %v2883_v40, %s2414_s28 }
 0x2a2   :  { %1261 = vrot.lane.b32.xlu1 %v2883_v40, %s2412_s26 }
 0x2a9   :  { %1271 = vrot.lane.b32.xlu2 %v2885_v41, %s2413_s27  ;;  %1517 = vrot.lane.b32.xlu0 %v2885_v41, %s2416_s30 }
 0x2aa   :  { %1269 = vrot.lane.b32.xlu1 %v2883_v40, %s2413_s27 }
 0x2b1   :  { %1419 = vrot.lane.b32.xlu2 %v2885_v41, %s2415_s29  ;;  %1568 = vrot.lane.b32.xlu0 %v2883_v40, %s2417_s8 }
 0x2b2   :  { %1417 = vrot.lane.b32.xlu1 %v2883_v40, %s2415_s29 }
 0x2b9   :  { %1515 = vrot.lane.b32.xlu2 %v2883_v40, %s2416_s30  ;;  %1757 = vrot.lane.b32.xlu0 %v2905_v43, %s2413_s27 }
 0x2ba   :  { %1366 = vrot.lane.b32.xlu1 %v2885_v41, %s2414_s28 }
 0x2c1   :  { %1623 = vrot.lane.b32.xlu2 %v2885_v41, %s2418_s9  ;;  %1843 = vrot.lane.b32.xlu0 %v2914_v47, %s2414_s28 }
 0x2c2   :  { %1621 = vrot.lane.b32.xlu1 %v2883_v40, %s2418_s9 }
 0x2c9   :  { %1749 = vrot.lane.b32.xlu0 %v2905_v43, %s2412_s26  ;;  %1755 = vrot.lane.b32.xlu2 %v2914_v47, %s2413_s27 }
 0x2ca   :  { %1570 = vrot.lane.b32.xlu1 %v2885_v41, %s2417_s8 }
 0x2d1   :  { %2035 = vrot.lane.b32.xlu0 %v2914_v47, %s2417_s8  ;;  %1676 = vrot.lane.b32.xlu2 %v2885_v41, %s2419_s12 }
 0x2d2   :  { %1674 = vrot.lane.b32.xlu1 %v2883_v40, %s2419_s12 }
 0x2d9   :  { %1987 = vrot.lane.b32.xlu0 %v2905_v43, %s2416_s30  ;;  %1747 = vrot.lane.b32.xlu2 %v2914_v47, %s2412_s26 }
 0x2da   :  { %1845 = vrot.lane.b32.xlu1 %v2905_v43, %s2414_s28 }
 0x2e1   :  { %2085 = vrot.lane.b32.xlu0 %v2914_v47, %s2418_s9  ;;  %1895 = vrot.lane.b32.xlu2 %v2905_v43, %s2415_s29 }
 0x2e2   :  { %1893 = vrot.lane.b32.xlu1 %v2914_v47, %s2415_s29 }
 0x2e9   :  { %1985 = vrot.lane.b32.xlu2 %v2914_v47, %s2416_s30 }
 0x2ea   :  { %2037 = vrot.lane.b32.xlu1 %v2905_v43, %s2417_s8 }
 0x2f1   :  { %2137 = vrot.lane.b32.xlu2 %v2905_v43, %s2419_s12 }
 0x2f2   :  { %2135 = vrot.lane.b32.xlu1 %v2914_v47, %s2419_s12 }
 0x2fa   :  { %2087 = vrot.lane.b32.xlu1 %v2905_v43, %s2418_s9 }
 0x2fb   :  { %v1264_v49 = vpop.permute.xlu2 %1263 }
 0x303   :  { %v1272_v50 = vpop.permute.xlu2 %1271 }
 0x30b   :  { %v1420_v51 = vpop.permute.xlu2 %1419 }
 0x313   :  { %v1365_v52 = vpop.permute.xlu0 %1364  ;;  %v1516_v57 = vpop.permute.xlu2 %1515 }
 0x314   :  { %v1262_v53 = vpop.permute.xlu1 %1261 }
 0x315   :  { %v1265_v55 = vsel %vm3228_vm2, %v1262_v53, %v1264_v49  ;;  %v1266_v56 = vsel %vm3228_vm2, %v1264_v49, %v1262_v53 }
 0x316   :  { %2334 = vmatpush.msk.msrb.mxu2 %vm2529_vm3, %v1266_v56  ;;  %2336 = vmatpush.msk.msrb.mxu3 %vm2534_vm6, %v1265_v55 }
 0x317   :  { %2335 = vmatmul.msk.f32.vlgmr.msrb.gmra.mxu2 %vm1277_vm7, %v2959_v54  ;;  %2337 = vmatmul.msk.f32.vlgmr.msrb.gmra.mxu3 %vm1277_vm7, %v2959_v54 }
 0x31b   :  { %v1518_v58 = vpop.permute.xlu0 %1517  ;;  %v1624_v1 = vpop.permute.xlu2 %1623 }
 0x31c   :  { %v1270_v60 = vpop.permute.xlu1 %1269 }
 0x31d   :  { %v1273_v63 = vsel %vm94_vm8, %v1270_v60, %v1272_v50  ;;  %v1274_v32 = vsel %vm94_vm8, %v1272_v50, %v1270_v60 }
 0x31e   :  { %2331 = vmatpush.msk.msrb.mxu0 %vm3253_vm0, %v1274_v32  ;;  %1316 = vmatpush.msrb.mxu1 %v1273_v63  ;;  %vm3256_vm0 = vcmp.lt.s32.totalorder %v2509_v35, 127 }
 0x31f   :  { %2332 = vmatmul.msk.f32.vlgmr.msrb.gmra.mxu0 %vm1277_vm7, %v2976_v61  ;;  %2333 = vmatmul.msk.f32.vlgmr.msrb.gmra.mxu1 %vm1277_vm7, %v2976_v61  ;;  %v1519_v8 = vsel %vm3256_vm0, %v1516_v57, %v1518_v58  ;;  %vm3257_vm2 = vmmov %vm3256_vm0 }
 0x320   :  { %v1520_v28 = vsel %vm3257_vm2, %v1518_v58, %v1516_v57  ;;  %vm3258_vm2 = vcmp.lt.s32.totalorder %v2509_v35, 15 }
 0x323   :  { %v1569_v59 = vpop.permute.xlu0 %1568  ;;  %v1756_v14 = vpop.permute.xlu2 %1755 }
 0x324   :  { %v1418_v2 = vpop.permute.xlu1 %1417 }
 0x325   :  { %v1421_v3 = vsel %vm3254_vm10, %v1418_v2, %v1420_v51  ;;  %v1422_v6 = vsel %vm3255_vm5, %v1420_v51, %v1418_v2  ;;  %vm3259_vm5 = vmmov %vm3258_vm2  ;;  %vm3260_vm10 = vcmp.lt.s32.totalorder %v2509_v35, 112 }
 0x326   :  { %2342 = vmatpush.msk.msra.mxu2 %vm2516_vm1, %v1422_v6  ;;  %2344 = vmatpush.msk.msra.mxu3 %vm2534_vm6, %v1421_v3  ;;  %vm3261_vm0 = vmmov %vm3260_vm10 }
 0x327   :  { %2343 = vmatmul.msk.f32.vlgmr.msra.gmra.mxu2 %vm1277_vm7, %v2995_v7  ;;  %2345 = vmatmul.msk.f32.vlgmr.msra.gmra.mxu3 %vm1277_vm7, %v2995_v7 }
 0x328   :  { %2348 = vmatpush.msk.msrb.mxu2 %vm2592_vm9, %v1519_v8  ;;  %2350 = vmatpush.msk.msrb.mxu3 %vm2612_vm12, %v1520_v28 }
 0x32b   :  { %v1758_v11 = vpop.permute.xlu0 %1757  ;;  %v1677_v25 = vpop.permute.xlu2 %1676 }
 0x32c   :  { %v1367_v29 = vpop.permute.xlu1 %1366  ;;  %v1759_v23 = vsel %vm94_vm8, %v1756_v14, %v1758_v11  ;;  %v1760_v24 = vsel %vm94_vm8, %v1758_v11, %v1756_v14  ;;  %vm3263_vm8 = vcmp.lt.s32.totalorder %v2509_v35, 113 }
 0x32d   :  { %v1368_v13 = vsel %vm3258_vm2, %v1365_v52, %v1367_v29  ;;  %v1369_v9 = vsel %vm3259_vm5, %v1367_v29, %v1365_v52  ;;  %vm3262_vm2 = vcmp.ge.s32.totalorder %v2509_v35, 16  ;;  %vm3264_vm5 = vmmov %vm3263_vm8 }
 0x32e   :  { %2338 = vmatpush.msk.msra.mxu0 %vm2608_vm11, %v1369_v9  ;;  %2340 = vmatpush.msk.msra.mxu1 %vm2612_vm12, %v1368_v13 }
 0x32f   :  { %2339 = vmatmul.msk.f32.vlgmr.msra.gmra.mxu0 %vm1277_vm7, %v58_v12  ;;  %2341 = vmatmul.msk.f32.vlgmr.msra.gmra.mxu1 %vm1277_vm7, %v58_v12 }
 0x330   :  { %1488 = vmatpush.msrb.mxu0 %v2883_v40  ;;  %1508 = vmatpush.msrb.mxu1 %v2885_v41 }
 0x331   :  { %2349 = vmatmul.msk.f32.vlgmr.msrb.gmra.mxu2 %vm1277_vm7, %v3027_v10  ;;  %2351 = vmatmul.msk.f32.vlgmr.msrb.gmra.mxu3 %vm1277_vm7, %v3027_v10 }
 0x333   :  { %v1844_v21 = vpop.permute.xlu0 %1843  ;;  %v1748_v33 = vpop.permute.xlu2 %1747 }
 0x334   :  { %v1622_v16 = vpop.permute.xlu1 %1621 }
 0x335   :  { %v1625_v18 = vsel %vm3260_vm10, %v1622_v16, %v1624_v1  ;;  %v1626_v19 = vsel %vm3261_vm0, %v1624_v1, %v1622_v16  ;;  %vm3265_vm10 = vcmp.lt.s32.totalorder %v2509_v35, 17 }
 0x336   :  { %1647 = vmatpush.msra.mxu2 %v1625_v18  ;;  %2357 = vmatpush.msk.msra.mxu3 %vm34_vm14, %v1626_v19  ;;  %vm3266_vm0 = vmmov %vm3265_vm10 }
 0x337   :  { %2346 = vmatmul.msk.f32.vlgmr.msrb.gmra.mxu0 %vm1277_vm7, %v3040_v62  ;;  %2347 = vmatmul.msk.f32.vlgmr.msrb.gmra.mxu1 %vm1277_vm7, %v3040_v62 }
 0x338   :  { %2363 = vmatpush.msk.msrb.mxu2 %vm3262_vm2, %v1760_v24  ;;  %1798 = vmatpush.msrb.mxu3 %v1759_v23  ;;  %vm3267_vm2 = vcmp.lt.s32.totalorder %v2509_v35, 15 }
 0x339   :  { %2356 = vmatmul.msk.f32.vlgmr.msra.gmra.mxu2 %vm1277_vm7, %v3051_v22  ;;  %2358 = vmatmul.msk.f32.vlgmr.msra.gmra.mxu3 %vm1277_vm7, %v3051_v22 }
 0x33b   :  { %v1750_v31 = vpop.permute.xlu0 %1749  ;;  %v1896_v46 = vpop.permute.xlu2 %1895 }
 0x33c   :  { %v1571_v26 = vpop.permute.xlu1 %1570  ;;  %v1751_v15 = vsel %vm3265_vm10, %v1748_v33, %v1750_v31  ;;  %v1752_v48 = vsel %vm3266_vm0, %v1750_v31, %v1748_v33 }
 0x33d   :  { %v1572_v30 = vsel %vm3263_vm8, %v1569_v59, %v1571_v26  ;;  %v1573_v17 = vsel %vm3264_vm5, %v1571_v26, %v1569_v59  ;;  %vm3268_vm8 = vmmov %vm3267_vm2  ;;  %vm3271_vm5 = vcmp.lt.s32.totalorder %v2509_v35, 127 }
 0x33e   :  { %2352 = vmatpush.msk.msra.mxu0 %vm2516_vm1, %v1572_v30  ;;  %2354 = vmatpush.msk.msra.mxu1 %vm2675_vm13, %v1573_v17  ;;  %vm3272_vm10 = vmmov %vm3271_vm5 }
 0x33f   :  { %2353 = vmatmul.msk.f32.vlgmr.msra.gmra.mxu0 %vm1277_vm7, %v62_v27  ;;  %2355 = vmatmul.msk.f32.vlgmr.msra.gmra.mxu1 %vm1277_vm7, %v62_v27 }
 0x341   :  { %2364 = vmatmul.msk.f32.vlgmr.msrb.gmra.mxu2 %vm1277_vm7, %v2976_v61  ;;  %2365 = vmatmul.msk.f32.vlgmr.msrb.gmra.mxu3 %vm1277_vm7, %v2976_v61 }
 0x343   :  { %v2036_v44 = vpop.permute.xlu0 %2035  ;;  %v1986_v55 = vpop.permute.xlu2 %1985 }
 0x344   :  { %v1675_v34 = vpop.permute.xlu1 %1674 }
 0x345   :  { %v1678_v40 = vsel %vm609_vm4, %v1675_v34, %v1677_v25  ;;  %v1679_v41 = vsel %vm609_vm4, %v1677_v25, %v1675_v34 }
 0x346   :  { %2359 = vmatpush.msk.msrb.mxu0 %vm2592_vm9, %v1678_v40  ;;  %2361 = vmatpush.msk.msrb.mxu1 %vm2721_vm15, %v1679_v41 }
 0x347   :  { %2360 = vmatmul.msk.f32.vlgmr.msrb.gmra.mxu0 %vm1277_vm7, %v64_v36  ;;  %2362 = vmatmul.msk.f32.vlgmr.msrb.gmra.mxu1 %vm1277_vm7, %v64_v36 }
 0x348   :  { %2366 = vmatpush.msk.msra.mxu0 %vm2529_vm3, %v1752_v48  ;;  %2368 = vmatpush.msk.msra.mxu1 %vm2534_vm6, %v1751_v15  ;;  %vm3269_vm3 = vcmp.lt.s32.totalorder %v2509_v35, 1 }
 0x34b   :  { %v1988_v42 = vpop.permute.xlu0 %1987  ;;  %v2138_v5 = vpop.permute.xlu2 %2137 }
 0x34c   :  { %v1846_v49 = vpop.permute.xlu1 %1845 }
 0x34d   :  { %v1847_v50 = vsel %vm3267_vm2, %v1844_v21, %v1846_v49  ;;  %v1848_v51 = vsel %vm3268_vm8, %v1846_v49, %v1844_v21 }
 0x34e   :  { %2370 = vmatpush.msk.msra.mxu2 %vm2608_vm11, %v1848_v51  ;;  %2372 = vmatpush.msk.msra.mxu3 %vm2612_vm12, %v1847_v50  ;;  %vm3270_vm11 = vmmov %vm3269_vm3 }
 0x34f   :  { %2371 = vmatmul.msk.f32.vlgmr.msra.gmra.mxu2 %vm1277_vm7, %v58_v12  ;;  %2373 = vmatmul.msk.f32.vlgmr.msra.gmra.mxu3 %vm1277_vm7, %v58_v12 }
 0x350   :  { %1958 = vmatpush.msrb.mxu2 %v2914_v47  ;;  %1978 = vmatpush.msrb.mxu3 %v2905_v43  ;;  %v1989_v43 = vsel %vm3271_vm5, %v1986_v55, %v1988_v42  ;;  %v1990_v47 = vsel %vm3272_vm10, %v1988_v42, %v1986_v55 }
 0x351   :  { %2367 = vmatmul.msk.f32.vlgmr.msra.gmra.mxu0 %vm1277_vm7, %v2959_v54  ;;  %2369 = vmatmul.msk.f32.vlgmr.msra.gmra.mxu1 %vm1277_vm7, %v2959_v54 }
 0x353   :  { %v2086_v20 = vpop.permute.xlu0 %2085 }
 0x354   :  { %v1894_v4 = vpop.permute.xlu1 %1893 }
 0x355   :  { %v1897_v52 = vsel %vm3269_vm3, %v1894_v4, %v1896_v46  ;;  %v1898_v53 = vsel %vm3270_vm11, %v1896_v46, %v1894_v4 }
 0x356   :  { %2374 = vmatpush.msk.msrb.mxu0 %vm2516_vm1, %v1898_v53  ;;  %2376 = vmatpush.msk.msrb.mxu1 %vm2534_vm6, %v1897_v52  ;;  %vm3273_vm6 = vcmp.lt.s32.totalorder %v2509_v35, 113 }
 0x357   :  { %2378 = vmatmul.msk.f32.vlgmr.msrb.gmra.mxu2 %vm1277_vm7, %v3040_v62  ;;  %2379 = vmatmul.msk.f32.vlgmr.msrb.gmra.mxu3 %vm1277_vm7, %v3040_v62  ;;  %vm3274_vm0 = vmmov %vm3273_vm6 }
 0x358   :  { %2380 = vmatpush.msk.msra.mxu0 %vm2592_vm9, %v1989_v43  ;;  %2382 = vmatpush.msk.msra.mxu1 %vm2612_vm12, %v1990_v47 }
 0x359   :  { %2375 = vmatmul.msk.f32.vlgmr.msrb.gmra.mxu0 %vm1277_vm7, %v2995_v7  ;;  %2377 = vmatmul.msk.f32.vlgmr.msrb.gmra.mxu1 %vm1277_vm7, %v2995_v7 }
 0x35c   :  { %v2038_v45 = vpop.permute.xlu1 %2037 }
 0x35d   :  { %v2039_v54 = vsel %vm3273_vm6, %v2036_v44, %v2038_v45  ;;  %v2040_v56 = vsel %vm3274_vm0, %v2038_v45, %v2036_v44 }
 0x35e   :  { %2384 = vmatpush.msk.msra.mxu2 %vm2516_vm1, %v2039_v54  ;;  %2386 = vmatpush.msk.msra.mxu3 %vm2675_vm13, %v2040_v56  ;;  %vm3275_vm1 = vcmp.lt.s32.totalorder %v2509_v35, 112 }
 0x35f   :  { %2385 = vmatmul.msk.f32.vlgmr.msra.gmra.mxu2 %vm1277_vm7, %v62_v27  ;;  %2387 = vmatmul.msk.f32.vlgmr.msra.gmra.mxu3 %vm1277_vm7, %v62_v27  ;;  %vm3276_vm12 = vmmov %vm3275_vm1 }
 0x361   :  { %2381 = vmatmul.msk.f32.vlgmr.msra.gmra.mxu0 %vm1277_vm7, %v3027_v10  ;;  %2383 = vmatmul.msk.f32.vlgmr.msra.gmra.mxu1 %vm1277_vm7, %v3027_v10 }
 0x364   :  { %v2136_v57 = vpop.permute.xlu1 %2135 }
 0x365   :  { %v2139_v58 = vsel %vm609_vm4, %v2136_v57, %v2138_v5  ;;  %v2140_v38 = vsel %vm609_vm4, %v2138_v5, %v2136_v57  ;;  %vm3277_vm4 = vcmask 1043456  }
 0x366   :  { %2391 = vmatpush.msk.msrb.mxu2 %vm2592_vm9, %v2139_v58  ;;  %2393 = vmatpush.msk.msrb.mxu3 %vm2721_vm15, %v2140_v38  ;;  %vm3278_vm9 = vmmov %vm3277_vm4 }
 0x367   :  { %2392 = vmatmul.msk.f32.vlgmr.msrb.gmra.mxu2 %vm1277_vm7, %v64_v36  ;;  %2394 = vmatmul.msk.f32.vlgmr.msrb.gmra.mxu3 %vm1277_vm7, %v64_v36  ;;  %vm3279_vm13 = vmmov %vm3277_vm4 }
 0x368   :  { %vm3281_vm15 = vmmov %vm3277_vm4 }
 0x369   :  { %vm3283_vm2 = vmmov %vm3277_vm4 }
 0x36a   :  { %vm3284_vm8 = vmmov %vm3283_vm2 }
 0x36b   :  { %vm3285_vm10 = vmmov %vm3283_vm2 }
 0x36c   :  { %v2088_v60 = vpop.permute.xlu1 %2087  ;;  %vm3286_vm6 = vmmov %vm3283_vm2 }
 0x36d   :  { %v2089_v61 = vsel %vm3275_vm1, %v2086_v20, %v2088_v60  ;;  %v2090_v63 = vsel %vm3276_vm12, %v2088_v60, %v2086_v20 }
 0x36e   :  { %2108 = vmatpush.msrb.mxu0 %v2089_v61  ;;  %2389 = vmatpush.msk.msrb.mxu1 %vm34_vm14, %v2090_v63  ;;  %vm3280_vm14 = vmmov %vm3277_vm4 }
 0x36f   :  { %2388 = vmatmul.msk.f32.vlgmr.msrb.gmra.mxu0 %vm1277_vm7, %v3051_v22  ;;  %2390 = vmatmul.msk.f32.vlgmr.msrb.gmra.mxu1 %vm1277_vm7, %v3051_v22  ;;  %vm3282_vm7 = vmmov %vm3277_vm4 }
 0x39a   :  { %v1341_v0 = vpop.f32.mrf.mxu2  ;;  %v1361_v39 = vpop.f32.mrf.mxu3 }
 0x39c   :  { %v1298_v32 = vpop.f32.mrf.mxu0  ;;  %v1318_v59 = vpop.f32.mrf.mxu1 }
 0x39d   :  { %v1342_v35 = vadd.f32 %v1341_v0, %v1298_v32  ;;  %v1362_v7 = vadd.f32 %v1361_v39, %v1318_v59 }
 0x3aa   :  { %v1445_v1 = vpop.f32.mrf.mxu2  ;;  %v1465_v2 = vpop.f32.mrf.mxu3 }
 0x3ac   :  { %v1392_v3 = vpop.f32.mrf.mxu0  ;;  %v1412_v6 = vpop.f32.mrf.mxu1 }
 0x3ad   :  { %v1415_v8 = vadd.f32 %v1392_v3, %v1342_v35  ;;  %v1416_v28 = vadd.f32 %v1412_v6, %v1362_v7 }
 0x3af   :  { %v1468_v13 = vadd.f32 %v1445_v1, %v1415_v8  ;;  %v1469_v9 = vadd.f32 %v1465_v2, %v1416_v28 }
 0x3b4   :  { %v1490_v37 = vpop.f32.mrf.mxu0  ;;  %v1510_v29 = vpop.f32.mrf.mxu1 }
 0x3b5   :  { %v1543_v11 = vpop.f32.mrf.mxu2  ;;  %v1563_v12 = vpop.f32.mrf.mxu3  ;;  %v1513_v14 = vadd.f32 %v1490_v37, %v1468_v13  ;;  %v1514_v10 = vadd.f32 %v1510_v29, %v1469_v9 }
 0x3b7   :  { %v1566_v18 = vadd.f32 %v1543_v11, %v1513_v14  ;;  %v1567_v19 = vadd.f32 %v1563_v12, %v1514_v10 }
 0x3bc   :  { %v1596_v16 = vpop.f32.mrf.mxu0  ;;  %v1616_v62 = vpop.f32.mrf.mxu1 }
 0x3bd   :  { %v1619_v21 = vadd.f32 %v1596_v16, %v1566_v18  ;;  %v1620_v22 = vadd.f32 %v1616_v62, %v1567_v19  ;;  %v1649_v23 = vpop.f32.mrf.mxu2  ;;  %v1669_v24 = vpop.f32.mrf.mxu3 }
 0x3bf   :  { %v1672_v25 = vadd.f32 %v1649_v23, %v1619_v21  ;;  %v1673_v26 = vadd.f32 %v1669_v24, %v1620_v22 }
 0x3c4   :  { %v1702_v27 = vpop.f32.mrf.mxu0  ;;  %v1722_v30 = vpop.f32.mrf.mxu1 }
 0x3c5   :  { %v3179_v17 = vadd.f32 %v1702_v27, %v1672_v25  ;;  %v3181_v31 = vadd.f32 %v1722_v30, %v1673_v26  ;;  %v1780_v41 = vpop.f32.mrf.mxu2  ;;  %v1800_v15 = vpop.f32.mrf.mxu3 }
 0x3c7   :  { %v1727_v33 = vsel %vm3277_vm4, %v3179_v17, 0.0  ;;  %v1728_v34 = vsel %vm3278_vm9, %v3181_v31, 0.0  ;;  %v1733_v36 = vmul.f32 %v3179_v17, %v3179_v17  ;;  %v1734_v40 = vmul.f32 %v3181_v31, %v3181_v31 }
 0x3c8   :  { %v1729_v48 = vadd.f32 %v1728_v34, %v1727_v33 }
 0x3c9   :  { %v1735_v44 = vsel %vm3279_vm13, %v1733_v36, 0.0  ;;  %v1736_v46 = vsel %vm3280_vm14, %v1734_v40, 0.0 }
 0x3ca   :  { %1730 = vadd.xlane.f32.xlu2 %v1729_v48  ;;  %v1737_v49 = vadd.f32 %v1736_v46, %v1735_v44  ;;  %v2200_v46 = vld [vmem:[%s3219_s6] sm:$0xf] }
 0x3cc   :  { %1738 = vadd.xlane.f32.xlu1 %v1737_v49 }
 0x3ce   :  { %v1820_v50 = vpop.f32.mrf.mxu0  ;;  %v1840_v51 = vpop.f32.mrf.mxu1 }
 0x3cf   :  { %v1821_v47 = vadd.f32 %v1820_v50, %v1780_v41  ;;  %v1841_v45 = vadd.f32 %v1840_v51, %v1800_v15  ;;  %v2199_v41 = vld [vmem:[%s3218_s5] sm:$0xf] }
 0x3d2   :  { %v1868_v42 = vpop.f32.mrf.mxu2  ;;  %v1888_v4 = vpop.f32.mrf.mxu3 }
 0x3d3   :  { %v1891_v54 = vadd.f32 %v1868_v42, %v1821_v47  ;;  %v1892_v56 = vadd.f32 %v1888_v4, %v1841_v45 }
 0x3d6   :  { %v1918_v52 = vpop.f32.mrf.mxu0  ;;  %v1938_v53 = vpop.f32.mrf.mxu1 }
 0x3d7   :  { %v1941_v5 = vadd.f32 %v1918_v52, %v1891_v54  ;;  %v1942_v57 = vadd.f32 %v1938_v53, %v1892_v56 }
 0x3da   :  { %v1960_v55 = vpop.f32.mrf.mxu2  ;;  %v1980_v43 = vpop.f32.mrf.mxu3 }
 0x3db   :  { %v1983_v61 = vadd.f32 %v1960_v55, %v1941_v5  ;;  %v1984_v63 = vadd.f32 %v1980_v43, %v1942_v57 }
 0x3de   :  { %v2010_v20 = vpop.f32.mrf.mxu0  ;;  %v2030_v60 = vpop.f32.mrf.mxu1 }
 0x3df   :  { %v2033_v0 = vadd.f32 %v2010_v20, %v1983_v61  ;;  %v2034_v39 = vadd.f32 %v2030_v60, %v1984_v63 }
 0x3e2   :  { %v2060_v58 = vpop.f32.mrf.mxu2  ;;  %v2080_v38 = vpop.f32.mrf.mxu3 }
 0x3e3   :  { %v2083_v32 = vadd.f32 %v2060_v58, %v2033_v0  ;;  %v2084_v59 = vadd.f32 %v2080_v38, %v2034_v39 }
 0x3ea   :  { %v2160_v1 = vpop.f32.mrf.mxu2  ;;  %v2180_v2 = vpop.f32.mrf.mxu3 }
 0x3ec   :  { %v2110_v3 = vpop.f32.mrf.mxu0  ;;  %v2130_v6 = vpop.f32.mrf.mxu1 }
 0x3ed   :  { %v2133_v35 = vadd.f32 %v2110_v3, %v2083_v32  ;;  %v2134_v7 = vadd.f32 %v2130_v6, %v2084_v59 }
 0x3ef   :  { %v2183_v8 = vadd.f32 %v2160_v1, %v2133_v35  ;;  %v2184_v28 = vadd.f32 %v2180_v2, %v2134_v7 }
 0x3f1   :  { %v2185_v37 = vsel %vm3281_vm15, %v2183_v8, 0.0  ;;  %v2186_v29 = vsel %vm3282_vm7, %v2184_v28, 0.0  ;;  %v2191_v11 = vmul.f32 %v2183_v8, %v2183_v8  ;;  %v2192_v12 = vmul.f32 %v2184_v28, %v2184_v28 }
 0x3f2   :  { %v2187_v13 = vadd.f32 %v2186_v29, %v2185_v37 }
 0x3f3   :  { %v2193_v9 = vsel %vm3283_vm2, %v2191_v11, 0.0  ;;  %v2194_v14 = vsel %vm3284_vm8, %v2192_v12, 0.0 }
 0x3f4   :  { %2188 = vadd.xlane.f32.xlu0 %v2187_v13  ;;  %v2195_v10 = vadd.f32 %v2194_v14, %v2193_v9 }
 0x3f6   :  { %2196 = vadd.xlane.f32.xlu2 %v2195_v10 }
 0x43d   :  { %v1731_v16 = vpop.xlane.xlu2 %1730 }
 0x43f   :  { %v1739_v19 = vpop.xlane.xlu1 %1738 }
 0x467   :  { %v2189_v62 = vpop.xlane.xlu0 %2188 }
 0x468   :  { %v2190_v18 = vadd.f32 %v2189_v62, %v1731_v16 }
 0x469   :  { %v2197_v21 = vpop.xlane.xlu2 %2196 }
 0x46a   :  { %v2201_v22 = vmul.f32 0.001953125, %v2190_v18  ;;  %v2198_v23 = vadd.f32 %v2197_v21, %v1739_v19 }
 0x46c   :  { %v2203_v24 = vmul.f32 %v2201_v22, %v2201_v22  ;;  %v2202_v25 = vmul.f32 0.001953125, %v2198_v23 }
 0x46e   :  { %v2204_v26 = vsub.f32 %v2202_v25, %v2203_v24 }
 0x470   :  { %v2205_v27 = vadd.f32 1e-05, %v2204_v26 }
 0x472   :  { %2410 = vrsqrt.f32 %v2205_v27  ;;  %vm2212_vm11 = vweird.f32 %v2205_v27 }
 0x478   :  { %v2411_v30 = vpop.eup %2410 }
 0x479   :  { %v2207_v33 = vmul.f32 %v2411_v30, %v2205_v27  ;;  %vm2213_vm3 = vweird.f32 %v2411_v30 }
 0x47a   :  { %vm2214_vm5 = vmor %vm2212_vm11, %vm2213_vm3 }
 0x47b   :  { %v2208_v34 = vmul.f32 %v2411_v30, %v2207_v33 }
 0x47d   :  { %v2209_v36 = vmul.f32 0.5, %v2208_v34 }
 0x47f   :  { %v2210_v40 = vsub.f32 1.5, %v2209_v36 }
 0x481   :  { %v2211_v15 = vmul.f32 %v2411_v30, %v2210_v40 }
 0x483   :  { %v2215_v48 = vsel %vm2214_vm5, %v2411_v30, %v2211_v15 }
 0x484   :  { %v2216_v44 = vmul.f32 %v2215_v48, %v2199_v41 }
 0x486   :  { %2221 = vperm.xlu0 %2406, %v2216_v44   ;;  %v2217_v49 = vmul.f32 %v2216_v44, %v2201_v22 }
 0x488   :  { %v2218_v50 = vsub.f32 %v2200_v46, %v2217_v49 }
 0x48a   :  { %2228 = vperm.xlu1 %2407, %v2218_v50  }
 0x4f8   :  { %v2222_v51 = vpop.permute.xlu0 %2221 }
 0x4f9   :  { %v2224_v42 = vmul.f32 %v2222_v51, %v3179_v17  ;;  %v2225_v4 = vmul.f32 %v2222_v51, %v3181_v31  ;;  %v2241_v52 = vmul.f32 %v2222_v51, %v2183_v8  ;;  %v2242_v53 = vmul.f32 %v2222_v51, %v2184_v28 }
 0x4fc   :  { %v2229_v55 = vpop.permute.xlu1 %2228 }
 0x4fd   :  { %v2231_v43 = vadd.f32 %v2229_v55, %v2224_v42  ;;  %v2232_v47 = vadd.f32 %v2229_v55, %v2225_v4  ;;  %v2243_v45 = vadd.f32 %v2241_v52, %v2229_v55  ;;  %v2244_v54 = vadd.f32 %v2242_v53, %v2229_v55 }
 0x4ff   :  { %v2234_v56 = vmax.f32 %v2232_v47, 0.0  ;;  %v2246_v5 = vmax.f32 %v2244_v54, 0.0  ;;  %v2233_v57 = vmax.f32 %v2231_v43, 0.0  ;;  %v2245_v38 = vmax.f32 %v2243_v45, 0.0 }
 0x501   :  { %v2237_v58 = vrot.slane %v2234_v56, 4  ;;  %v2249_v20 = vrot.slane %v2246_v5, 4 }
 0x503   :  { %v2238_v60 = vsel %vm3285_vm10, %v2233_v57, %v2237_v58  ;;  %v2250_v61 = vsel %vm3286_vm6, %v2245_v38, %v2249_v20 }
 0x504   :  { %2240 = vst [vmem:[%s3220_s7] sm:$0xff] %v2238_v60 }
 0x505   :  { %2395 = vst [vmem:[%s3220_s7 + $0x8] sm:$0xff] %v2250_v61 }

</bundles_post_ra>
